<compile_context>
chip_gen: v5e
topology: v5e:2x2
jax: 0.10.0
libtpu: 0.0.40
codegen_flags: <defaults>
</compile_context>

<pallas_src>
import jax
import jax.numpy as jnp
import numpy as np
from jax.experimental import pallas as pl
from jax.experimental.pallas import tpu as pltpu


def _full_spec(shape):
    ndim = len(shape)
    return pl.BlockSpec(shape, lambda i, _n=ndim: (0,) * _n)


# ----------------------------- Pallas kernels ------------------------------

def conv_pool_kernel(p_ref, w_ref, b_ref, o_ref):
    """Fused conv(valid) + bias + ReLU + 2x2/2 max-pool for one image.

    p_ref: (1, 4, K, M)  pooled-window im2col taps, K = Cin*KH*KW,
                         M = PH*PW pooled pixels (lane-dense)
    w_ref: (Cout, K)     folded conv weight
    b_ref: (Cout, 1)
    o_ref: (1, Cout, M)  channel-major output (lane-dense over pixels)
    """
    w = w_ref[...]
    # max over the 4 pool-window positions of the pre-activation conv;
    # relu(max(.) + b) == pool(relu(conv + b)) since relu is monotone and b
    # is constant across the window.
    m = jnp.dot(w, p_ref[0, 0, :, :], preferred_element_type=jnp.float32)
    for q in range(1, 4):  # static unroll
        m = jnp.maximum(
            m, jnp.dot(w, p_ref[0, q, :, :], preferred_element_type=jnp.float32))
    o_ref[0, :, :] = jnp.maximum(m + b_ref[...], 0.0).astype(o_ref.dtype)


def mlp_kernel(x_ref, w1_ref, b1_ref, w2_ref, b2_ref, w3_ref, b3_ref, o_ref):
    """fc1 -> relu -> fc2 -> relu -> fc3, fused in one kernel."""
    h = jnp.maximum(jnp.dot(x_ref[...], w1_ref[...],
                            preferred_element_type=jnp.float32) + b1_ref[...], 0.0)
    h = jnp.maximum(jnp.dot(h, w2_ref[...],
                            preferred_element_type=jnp.float32) + b2_ref[...], 0.0)
    o_ref[...] = (jnp.dot(h, w3_ref[...],
                          preferred_element_type=jnp.float32)
                  + b3_ref[...]).astype(o_ref.dtype)


# ------------------------------ layer wrappers ------------------------------

def _pool_patches(x_nchw, kh, kw):
    """Pooled-window im2col: (N,Cin,H,W) -> (N, 4, Cin*kh*kw, PH*PW).

    patches[n, (qi,qj), (ci,dh,dw), (ph,pw)] = x[n, ci, 2*ph+qi+dh, 2*pw+qj+dw]
    """
    N, C, H, W = x_nchw.shape
    PH, PW = (H - kh + 1) // 2, (W - kw + 1) // 2
    quads = []
    for qi in range(2):
        for qj in range(2):
            taps = []
            for dh in range(kh):
                for dw in range(kw):
                    v = x_nchw[:, :,
                               qi + dh: qi + dh + 2 * PH: 2,
                               qj + dw: qj + dw + 2 * PW: 2]
                    taps.append(v.reshape(N, C, PH * PW))
            t = jnp.stack(taps, axis=2)                       # (N, C, kh*kw, M)
            quads.append(t.reshape(N, C * kh * kw, PH * PW))  # (ci, dh, dw) order
    return jnp.stack(quads, axis=1)                           # (N, 4, K, M)


def conv_relu_pool(x_nchw, w_oihw, b):
    """One fused conv+relu+pool stage.  NCHW in, NCHW out."""
    N, Cin, H, W = x_nchw.shape
    Cout, _, KH, KW = w_oihw.shape
    PH, PW = (H - KH + 1) // 2, (W - KW + 1) // 2
    K, M = Cin * KH * KW, PH * PW

    patches = _pool_patches(x_nchw, KH, KW)          # (N, 4, K, M)
    w2 = w_oihw.reshape(Cout, K)                     # folded contraction dim
    b2 = b.reshape(Cout, 1)

    out = pl.pallas_call(
        conv_pool_kernel,
        grid=(N,),                                   # one image per step
        in_specs=[pl.BlockSpec((1, 4, K, M), lambda n: (n, 0, 0, 0)),
                  pl.BlockSpec((Cout, K), lambda n: (0, 0)),
                  pl.BlockSpec((Cout, 1), lambda n: (0, 0))],
        out_specs=pl.BlockSpec((1, Cout, M), lambda n: (n, 0, 0)),
        out_shape=jax.ShapeDtypeStruct((N, Cout, M), jnp.float32),
        compiler_params=pltpu.CompilerParams(
            dimension_semantics=("parallel",)),      # megacore over batch
    )(patches, w2, b2)
    return out.reshape(N, Cout, PH, PW)              # channel-major (NCHW)


def mlp_head(x, fc_params):
    (w1, b1), (w2, b2), (w3, b3) = fc_params
    N, n_out = x.shape[0], w3.shape[1]
    args = (x, w1, b1.reshape(1, -1), w2, b2.reshape(1, -1),
            w3, b3.reshape(1, -1))
    return pl.pallas_call(
        mlp_kernel,
        grid=(1,),
        in_specs=[_full_spec(a.shape) for a in args],
        out_specs=_full_spec((N, n_out)),
        out_shape=jax.ShapeDtypeStruct((N, n_out), jnp.float32),
    )(*args)


def net_forward(x_nchw, params):
    x = conv_relu_pool(x_nchw, *params["conv1"])     # (N, 16, 30, 30)
    x = conv_relu_pool(x, *params["conv2"])          # (N,  8, 14, 14)
    x = conv_relu_pool(x, *params["conv3"])          # (N, 16,  6,  6)
    # Outputs are already NCHW, so PyTorch's x.view(N, -1) is a free reshape.
    x = x.reshape(x.shape[0], -1)                    # (N, 576)
    out = mlp_head(x, params["fc"])
    # TODO(synk): nn.Dropout(p=0.2) is identity in eval mode; training-mode
    # dropout (torch RNG) has no matching Pallas equivalent, left as identity.
    return out


# ------------------------------ params / checks ------------------------------

def init_params(key):
    def conv_p(k, cout, cin, kh, kw):
        s = 1.0 / np.sqrt(cin * kh * kw)
        kw_, kb = jax.random.split(k)
        return (jax.random.uniform(kw_, (cout, cin, kh, kw), jnp.float32, -s, s),
                jax.random.uniform(kb, (cout,), jnp.float32, -s, s))

    def lin_p(k, fin, fout):
        s = 1.0 / np.sqrt(fin)
        kw_, kb = jax.random.split(k)
        return (jax.random.uniform(kw_, (fin, fout), jnp.float32, -s, s),
                jax.random.uniform(kb, (fout,), jnp.float32, -s, s))

    k = jax.random.split(key, 6)
    return {
        "conv1": conv_p(k[0], 16, 1, 5, 5),
        "conv2": conv_p(k[1], 8, 16, 3, 3),
        "conv3": conv_p(k[2], 16, 8, 3, 3),
        "fc": (lin_p(k[3], 16 * 6 * 6, 120), lin_p(k[4], 120, 84),
               lin_p(k[5], 84, 2)),
    }


def reference_forward(x, params):
    def conv(x, w, b):
        y = jax.lax.conv_general_dilated(
            x, w, window_strides=(1, 1), padding="VALID",
            dimension_numbers=("NCHW", "OIHW", "NCHW"))
        return jax.nn.relu(y + b[None, :, None, None])

    def pool(x):
        return jax.lax.reduce_window(x, -jnp.inf, jax.lax.max,
                                     (1, 1, 2, 2), (1, 1, 2, 2), "VALID")

    x = pool(conv(x, *params["conv1"]))
    x = pool(conv(x, *params["conv2"]))
    x = pool(conv(x, *params["conv3"]))
    x = x.reshape(x.shape[0], -1)
    (w1, b1), (w2, b2), (w3, b3) = params["fc"]
    h = jax.nn.relu(x @ w1 + b1)
    h = jax.nn.relu(h @ w2 + b2)
    return h @ w3 + b3


if __name__ == "__main__":
    key = jax.random.PRNGKey(0)
    pk, xk = jax.random.split(key)
    params = init_params(pk)
    # Net requires 1x64x64 inputs (so fc1 sees 16*6*6 features); batch=2.
    x = jax.random.normal(xk, (2, 1, 64, 64), jnp.float32)

    out = jax.block_until_ready(jax.jit(net_forward)(x, params))
    ref = jax.block_until_ready(reference_forward(x, params))

    assert out.shape == (2, 2) and out.dtype == jnp.float32
    np.testing.assert_allclose(np.asarray(out), np.asarray(ref),
                               rtol=2e-2, atol=2e-2)
    print("KERNEL_OK")
</pallas_src>

<mosaic_0001>
module attributes {stable_mosaic.version = 11 : i64} {
  func.func @conv_pool_kernel(%arg0: i32, %arg1: memref<1x4x25x900xf32, #tpu.memory_space<vmem>>, %arg2: memref<16x25xf32, #tpu.memory_space<vmem>>, %arg3: memref<16x1xf32, #tpu.memory_space<vmem>>, %arg4: memref<1x16x900xf32, #tpu.memory_space<vmem>>) attributes {dimension_semantics = [#tpu.dimension_semantics<parallel>], iteration_bounds = array<i64: 2>, scalar_prefetch = 0 : i64, scratch_operands = 0 : i64, tpu.core_type = #tpu.core_type<tc>, window_params = [{transform_indices = @transform_0, window_bounds = array<i64: 1, 4, 25, 900>}, {pipeline_mode = #tpu.pipeline_mode<synchronous>, transform_indices = @transform_1, window_bounds = array<i64: 16, 25>}, {pipeline_mode = #tpu.pipeline_mode<synchronous>, transform_indices = @transform_2, window_bounds = array<i64: 16, 1>}, {transform_indices = @transform_3, window_bounds = array<i64: 1, 16, 900>}]} {
    %c0 = arith.constant 0 : index
    %c0_0 = arith.constant 0 : index
    %0 = vector.load %arg2[%c0, %c0_0] : memref<16x25xf32, #tpu.memory_space<vmem>>, vector<16x25xf32>
    %c0_1 = arith.constant 0 : index
    %c0_2 = arith.constant 0 : index
    %c0_3 = arith.constant 0 : index
    %c0_4 = arith.constant 0 : index
    %1 = vector.load %arg1[%c0_1, %c0_2, %c0_3, %c0_4] : memref<1x4x25x900xf32, #tpu.memory_space<vmem>>, vector<1x1x25x900xf32>
    %2 = vector.shape_cast %1 : vector<1x1x25x900xf32> to vector<25x900xf32>
    %cst = arith.constant dense<0.000000e+00> : vector<16x900xf32>
    %3 = tpu.matmul %0, %2, %cst {dimension_numbers = #tpu.dot_dimension_numbers<[1], [0], [0], [1], [0, 0, 1, 1], [], []>} : vector<16x25xf32>, vector<25x900xf32>, vector<16x900xf32> -> vector<16x900xf32>
    %c0_5 = arith.constant 0 : index
    %c1 = arith.constant 1 : index
    %c0_6 = arith.constant 0 : index
    %c0_7 = arith.constant 0 : index
    %4 = vector.load %arg1[%c0_5, %c1, %c0_6, %c0_7] : memref<1x4x25x900xf32, #tpu.memory_space<vmem>>, vector<1x1x25x900xf32>
    %5 = vector.shape_cast %4 : vector<1x1x25x900xf32> to vector<25x900xf32>
    %cst_8 = arith.constant dense<0.000000e+00> : vector<16x900xf32>
    %6 = tpu.matmul %0, %5, %cst_8 {dimension_numbers = #tpu.dot_dimension_numbers<[1], [0], [0], [1], [0, 0, 1, 1], [], []>} : vector<16x25xf32>, vector<25x900xf32>, vector<16x900xf32> -> vector<16x900xf32>
    %7 = arith.maximumf %3, %6 : vector<16x900xf32>
    %c0_9 = arith.constant 0 : index
    %c2 = arith.constant 2 : index
    %c0_10 = arith.constant 0 : index
    %c0_11 = arith.constant 0 : index
    %8 = vector.load %arg1[%c0_9, %c2, %c0_10, %c0_11] : memref<1x4x25x900xf32, #tpu.memory_space<vmem>>, vector<1x1x25x900xf32>
    %9 = vector.shape_cast %8 : vector<1x1x25x900xf32> to vector<25x900xf32>
    %cst_12 = arith.constant dense<0.000000e+00> : vector<16x900xf32>
    %10 = tpu.matmul %0, %9, %cst_12 {dimension_numbers = #tpu.dot_dimension_numbers<[1], [0], [0], [1], [0, 0, 1, 1], [], []>} : vector<16x25xf32>, vector<25x900xf32>, vector<16x900xf32> -> vector<16x900xf32>
    %11 = arith.maximumf %7, %10 : vector<16x900xf32>
    %c0_13 = arith.constant 0 : index
    %c3 = arith.constant 3 : index
    %c0_14 = arith.constant 0 : index
    %c0_15 = arith.constant 0 : index
    %12 = vector.load %arg1[%c0_13, %c3, %c0_14, %c0_15] : memref<1x4x25x900xf32, #tpu.memory_space<vmem>>, vector<1x1x25x900xf32>
    %13 = vector.shape_cast %12 : vector<1x1x25x900xf32> to vector<25x900xf32>
    %cst_16 = arith.constant dense<0.000000e+00> : vector<16x900xf32>
    %14 = tpu.matmul %0, %13, %cst_16 {dimension_numbers = #tpu.dot_dimension_numbers<[1], [0], [0], [1], [0, 0, 1, 1], [], []>} : vector<16x25xf32>, vector<25x900xf32>, vector<16x900xf32> -> vector<16x900xf32>
    %15 = arith.maximumf %11, %14 : vector<16x900xf32>
    %c0_17 = arith.constant 0 : index
    %c0_18 = arith.constant 0 : index
    %16 = vector.load %arg3[%c0_17, %c0_18] : memref<16x1xf32, #tpu.memory_space<vmem>>, vector<16x1xf32>
    %17 = vector.broadcast %16 : vector<16x1xf32> to vector<16x900xf32>
    %18 = arith.addf %15, %17 : vector<16x900xf32>
    %cst_19 = arith.constant 0.000000e+00 : f32
    %19 = vector.broadcast %cst_19 : f32 to vector<16x900xf32>
    %20 = arith.maximumf %18, %19 : vector<16x900xf32>
    %c0_20 = arith.constant 0 : index
    %c0_21 = arith.constant 0 : index
    %c0_22 = arith.constant 0 : index
    %21 = vector.load %arg4[%c0_20, %c0_21, %c0_22] : memref<1x16x900xf32, #tpu.memory_space<vmem>>, vector<1x16x900xf32>
    %22 = vector.shape_cast %21 : vector<1x16x900xf32> to vector<16x900xf32>
    %23 = vector.shape_cast %20 : vector<16x900xf32> to vector<1x16x900xf32>
    tpu.vector_store %arg4[%c0_20, %c0_21, %c0_22], %23 {strides = array<i32>} : memref<1x16x900xf32, #tpu.memory_space<vmem>>, vector<1x16x900xf32>,
    return
  }
  func.func @transform_0(%arg0: i32) -> (i32, i32, i32, i32) {
    %c0_i32 = arith.constant 0 : i32
    %c0_i32_0 = arith.constant 0 : i32
    %c0_i32_1 = arith.constant 0 : i32
    %c0_i32_2 = arith.constant 0 : i32
    return %arg0, %c0_i32, %c0_i32_0, %c0_i32_1 : i32, i32, i32, i32
  }
  func.func @transform_1(%arg0: i32) -> (i32, i32) {
    %c0_i32 = arith.constant 0 : i32
    %c0_i32_0 = arith.constant 0 : i32
    %c0_i32_1 = arith.constant 0 : i32
    return %c0_i32, %c0_i32_0 : i32, i32
  }
  func.func @transform_2(%arg0: i32) -> (i32, i32) {
    %c0_i32 = arith.constant 0 : i32
    %c0_i32_0 = arith.constant 0 : i32
    %c0_i32_1 = arith.constant 0 : i32
    return %c0_i32, %c0_i32_0 : i32, i32
  }
  func.func @transform_3(%arg0: i32) -> (i32, i32, i32) {
    %c0_i32 = arith.constant 0 : i32
    %c0_i32_0 = arith.constant 0 : i32
    %c0_i32_1 = arith.constant 0 : i32
    return %arg0, %c0_i32, %c0_i32_0 : i32, i32, i32
  }
}

module attributes {stable_mosaic.version = 11 : i64} {
  func.func @conv_pool_kernel(%arg0: i32, %arg1: memref<1x4x144x196xf32, #tpu.memory_space<vmem>>, %arg2: memref<8x144xf32, #tpu.memory_space<vmem>>, %arg3: memref<8x1xf32, #tpu.memory_space<vmem>>, %arg4: memref<1x8x196xf32, #tpu.memory_space<vmem>>) attributes {dimension_semantics = [#tpu.dimension_semantics<parallel>], iteration_bounds = array<i64: 2>, scalar_prefetch = 0 : i64, scratch_operands = 0 : i64, tpu.core_type = #tpu.core_type<tc>, window_params = [{transform_indices = @transform_0, window_bounds = array<i64: 1, 4, 144, 196>}, {pipeline_mode = #tpu.pipeline_mode<synchronous>, transform_indices = @transform_1, window_bounds = array<i64: 8, 144>}, {pipeline_mode = #tpu.pipeline_mode<synchronous>, transform_indices = @transform_2, window_bounds = array<i64: 8, 1>}, {transform_indices = @transform_3, window_bounds = array<i64: 1, 8, 196>}]} {
    %c0 = arith.constant 0 : index
    %c0_0 = arith.constant 0 : index
    %0 = vector.load %arg2[%c0, %c0_0] : memref<8x144xf32, #tpu.memory_space<vmem>>, vector<8x144xf32>
    %c0_1 = arith.constant 0 : index
    %c0_2 = arith.constant 0 : index
    %c0_3 = arith.constant 0 : index
    %c0_4 = arith.constant 0 : index
    %1 = vector.load %arg1[%c0_1, %c0_2, %c0_3, %c0_4] : memref<1x4x144x196xf32, #tpu.memory_space<vmem>>, vector<1x1x144x196xf32>
    %2 = vector.shape_cast %1 : vector<1x1x144x196xf32> to vector<144x196xf32>
    %cst = arith.constant dense<0.000000e+00> : vector<8x196xf32>
    %3 = tpu.matmul %0, %2, %cst {dimension_numbers = #tpu.dot_dimension_numbers<[1], [0], [0], [1], [0, 0, 1, 1], [], []>} : vector<8x144xf32>, vector<144x196xf32>, vector<8x196xf32> -> vector<8x196xf32>
    %c0_5 = arith.constant 0 : index
    %c1 = arith.constant 1 : index
    %c0_6 = arith.constant 0 : index
    %c0_7 = arith.constant 0 : index
    %4 = vector.load %arg1[%c0_5, %c1, %c0_6, %c0_7] : memref<1x4x144x196xf32, #tpu.memory_space<vmem>>, vector<1x1x144x196xf32>
    %5 = vector.shape_cast %4 : vector<1x1x144x196xf32> to vector<144x196xf32>
    %cst_8 = arith.constant dense<0.000000e+00> : vector<8x196xf32>
    %6 = tpu.matmul %0, %5, %cst_8 {dimension_numbers = #tpu.dot_dimension_numbers<[1], [0], [0], [1], [0, 0, 1, 1], [], []>} : vector<8x144xf32>, vector<144x196xf32>, vector<8x196xf32> -> vector<8x196xf32>
    %7 = arith.maximumf %3, %6 : vector<8x196xf32>
    %c0_9 = arith.constant 0 : index
    %c2 = arith.constant 2 : index
    %c0_10 = arith.constant 0 : index
    %c0_11 = arith.constant 0 : index
    %8 = vector.load %arg1[%c0_9, %c2, %c0_10, %c0_11] : memref<1x4x144x196xf32, #tpu.memory_space<vmem>>, vector<1x1x144x196xf32>
    %9 = vector.shape_cast %8 : vector<1x1x144x196xf32> to vector<144x196xf32>
    %cst_12 = arith.constant dense<0.000000e+00> : vector<8x196xf32>
    %10 = tpu.matmul %0, %9, %cst_12 {dimension_numbers = #tpu.dot_dimension_numbers<[1], [0], [0], [1], [0, 0, 1, 1], [], []>} : vector<8x144xf32>, vector<144x196xf32>, vector<8x196xf32> -> vector<8x196xf32>
    %11 = arith.maximumf %7, %10 : vector<8x196xf32>
    %c0_13 = arith.constant 0 : index
    %c3 = arith.constant 3 : index
    %c0_14 = arith.constant 0 : index
    %c0_15 = arith.constant 0 : index
    %12 = vector.load %arg1[%c0_13, %c3, %c0_14, %c0_15] : memref<1x4x144x196xf32, #tpu.memory_space<vmem>>, vector<1x1x144x196xf32>
    %13 = vector.shape_cast %12 : vector<1x1x144x196xf32> to vector<144x196xf32>
    %cst_16 = arith.constant dense<0.000000e+00> : vector<8x196xf32>
    %14 = tpu.matmul %0, %13, %cst_16 {dimension_numbers = #tpu.dot_dimension_numbers<[1], [0], [0], [1], [0, 0, 1, 1], [], []>} : vector<8x144xf32>, vector<144x196xf32>, vector<8x196xf32> -> vector<8x196xf32>
    %15 = arith.maximumf %11, %14 : vector<8x196xf32>
    %c0_17 = arith.constant 0 : index
    %c0_18 = arith.constant 0 : index
    %16 = vector.load %arg3[%c0_17, %c0_18] : memref<8x1xf32, #tpu.memory_space<vmem>>, vector<8x1xf32>
    %17 = vector.broadcast %16 : vector<8x1xf32> to vector<8x196xf32>
    %18 = arith.addf %15, %17 : vector<8x196xf32>
    %cst_19 = arith.constant 0.000000e+00 : f32
    %19 = vector.broadcast %cst_19 : f32 to vector<8x196xf32>
    %20 = arith.maximumf %18, %19 : vector<8x196xf32>
    %c0_20 = arith.constant 0 : index
    %c0_21 = arith.constant 0 : index
    %c0_22 = arith.constant 0 : index
    %21 = vector.load %arg4[%c0_20, %c0_21, %c0_22] : memref<1x8x196xf32, #tpu.memory_space<vmem>>, vector<1x8x196xf32>
    %22 = vector.shape_cast %21 : vector<1x8x196xf32> to vector<8x196xf32>
    %23 = vector.shape_cast %20 : vector<8x196xf32> to vector<1x8x196xf32>
    tpu.vector_store %arg4[%c0_20, %c0_21, %c0_22], %23 {strides = array<i32>} : memref<1x8x196xf32, #tpu.memory_space<vmem>>, vector<1x8x196xf32>,
    return
  }
  func.func @transform_0(%arg0: i32) -> (i32, i32, i32, i32) {
    %c0_i32 = arith.constant 0 : i32
    %c0_i32_0 = arith.constant 0 : i32
    %c0_i32_1 = arith.constant 0 : i32
    %c0_i32_2 = arith.constant 0 : i32
    return %arg0, %c0_i32, %c0_i32_0, %c0_i32_1 : i32, i32, i32, i32
  }
  func.func @transform_1(%arg0: i32) -> (i32, i32) {
    %c0_i32 = arith.constant 0 : i32
    %c0_i32_0 = arith.constant 0 : i32
    %c0_i32_1 = arith.constant 0 : i32
    return %c0_i32, %c0_i32_0 : i32, i32
  }
  func.func @transform_2(%arg0: i32) -> (i32, i32) {
    %c0_i32 = arith.constant 0 : i32
    %c0_i32_0 = arith.constant 0 : i32
    %c0_i32_1 = arith.constant 0 : i32
    return %c0_i32, %c0_i32_0 : i32, i32
  }
  func.func @transform_3(%arg0: i32) -> (i32, i32, i32) {
    %c0_i32 = arith.constant 0 : i32
    %c0_i32_0 = arith.constant 0 : i32
    %c0_i32_1 = arith.constant 0 : i32
    return %arg0, %c0_i32, %c0_i32_0 : i32, i32, i32
  }
}

module attributes {stable_mosaic.version = 11 : i64} {
  func.func @mlp_kernel(%arg0: i32, %arg1: memref<2x576xf32, #tpu.memory_space<vmem>>, %arg2: memref<576x120xf32, #tpu.memory_space<vmem>>, %arg3: memref<1x120xf32, #tpu.memory_space<vmem>>, %arg4: memref<120x84xf32, #tpu.memory_space<vmem>>, %arg5: memref<1x84xf32, #tpu.memory_space<vmem>>, %arg6: memref<84x2xf32, #tpu.memory_space<vmem>>, %arg7: memref<1x2xf32, #tpu.memory_space<vmem>>, %arg8: memref<2x2xf32, #tpu.memory_space<vmem>>) attributes {dimension_semantics = [#tpu.dimension_semantics<arbitrary>], iteration_bounds = array<i64: 1>, scalar_prefetch = 0 : i64, scratch_operands = 0 : i64, tpu.core_type = #tpu.core_type<tc>, window_params = [{pipeline_mode = #tpu.pipeline_mode<synchronous>, transform_indices = @transform_0, window_bounds = array<i64: 2, 576>}, {pipeline_mode = #tpu.pipeline_mode<synchronous>, transform_indices = @transform_1, window_bounds = array<i64: 576, 120>}, {pipeline_mode = #tpu.pipeline_mode<synchronous>, transform_indices = @transform_2, window_bounds = array<i64: 1, 120>}, {pipeline_mode = #tpu.pipeline_mode<synchronous>, transform_indices = @transform_3, window_bounds = array<i64: 120, 84>}, {pipeline_mode = #tpu.pipeline_mode<synchronous>, transform_indices = @transform_4, window_bounds = array<i64: 1, 84>}, {pipeline_mode = #tpu.pipeline_mode<synchronous>, transform_indices = @transform_5, window_bounds = array<i64: 84, 2>}, {pipeline_mode = #tpu.pipeline_mode<synchronous>, transform_indices = @transform_6, window_bounds = array<i64: 1, 2>}, {pipeline_mode = #tpu.pipeline_mode<synchronous>, transform_indices = @transform_7, window_bounds = array<i64: 2, 2>}]} {
    %c0 = arith.constant 0 : index
    %c0_0 = arith.constant 0 : index
    %0 = vector.load %arg1[%c0, %c0_0] : memref<2x576xf32, #tpu.memory_space<vmem>>, vector<2x576xf32>
    %c0_1 = arith.constant 0 : index
    %c0_2 = arith.constant 0 : index
    %1 = vector.load %arg2[%c0_1, %c0_2] : memref<576x120xf32, #tpu.memory_space<vmem>>, vector<576x120xf32>
    %cst = arith.constant dense<0.000000e+00> : vector<2x120xf32>
    %2 = tpu.matmul %0, %1, %cst {dimension_numbers = #tpu.dot_dimension_numbers<[1], [0], [0], [1], [0, 0, 1, 1], [], []>} : vector<2x576xf32>, vector<576x120xf32>, vector<2x120xf32> -> vector<2x120xf32>
    %c0_3 = arith.constant 0 : index
    %c0_4 = arith.constant 0 : index
    %3 = vector.load %arg3[%c0_3, %c0_4] : memref<1x120xf32, #tpu.memory_space<vmem>>, vector<1x120xf32>
    %4 = vector.broadcast %3 : vector<1x120xf32> to vector<2x120xf32>
    %5 = arith.addf %2, %4 : vector<2x120xf32>
    %cst_5 = arith.constant 0.000000e+00 : f32
    %6 = vector.broadcast %cst_5 : f32 to vector<2x120xf32>
    %7 = arith.maximumf %5, %6 : vector<2x120xf32>
    %c0_6 = arith.constant 0 : index
    %c0_7 = arith.constant 0 : index
    %8 = vector.load %arg4[%c0_6, %c0_7] : memref<120x84xf32, #tpu.memory_space<vmem>>, vector<120x84xf32>
    %cst_8 = arith.constant dense<0.000000e+00> : vector<2x84xf32>
    %9 = tpu.matmul %7, %8, %cst_8 {dimension_numbers = #tpu.dot_dimension_numbers<[1], [0], [0], [1], [0, 0, 1, 1], [], []>} : vector<2x120xf32>, vector<120x84xf32>, vector<2x84xf32> -> vector<2x84xf32>
    %c0_9 = arith.constant 0 : index
    %c0_10 = arith.constant 0 : index
    %10 = vector.load %arg5[%c0_9, %c0_10] : memref<1x84xf32, #tpu.memory_space<vmem>>, vector<1x84xf32>
    %11 = vector.broadcast %10 : vector<1x84xf32> to vector<2x84xf32>
    %12 = arith.addf %9, %11 : vector<2x84xf32>
    %cst_11 = arith.constant 0.000000e+00 : f32
    %13 = vector.broadcast %cst_11 : f32 to vector<2x84xf32>
    %14 = arith.maximumf %12, %13 : vector<2x84xf32>
    %c0_12 = arith.constant 0 : index
    %c0_13 = arith.constant 0 : index
    %15 = vector.load %arg6[%c0_12, %c0_13] : memref<84x2xf32, #tpu.memory_space<vmem>>, vector<84x2xf32>
    %cst_14 = arith.constant dense<0.000000e+00> : vector<2x2xf32>
    %16 = tpu.matmul %14, %15, %cst_14 {dimension_numbers = #tpu.dot_dimension_numbers<[1], [0], [0], [1], [0, 0, 1, 1], [], []>} : vector<2x84xf32>, vector<84x2xf32>, vector<2x2xf32> -> vector<2x2xf32>
    %c0_15 = arith.constant 0 : index
    %c0_16 = arith.constant 0 : index
    %17 = vector.load %arg7[%c0_15, %c0_16] : memref<1x2xf32, #tpu.memory_space<vmem>>, vector<1x2xf32>
    %18 = vector.broadcast %17 : vector<1x2xf32> to vector<2x2xf32>
    %19 = arith.addf %16, %18 : vector<2x2xf32>
    %c0_17 = arith.constant 0 : index
    %c0_18 = arith.constant 0 : index
    %20 = vector.load %arg8[%c0_17, %c0_18] : memref<2x2xf32, #tpu.memory_space<vmem>>, vector<2x2xf32>
    tpu.vector_store %arg8[%c0_17, %c0_18], %19 {strides = array<i32>} : memref<2x2xf32, #tpu.memory_space<vmem>>, vector<2x2xf32>,
    return
  }
  func.func @transform_0(%arg0: i32) -> (i32, i32) {
    %c0_i32 = arith.constant 0 : i32
    %c0_i32_0 = arith.constant 0 : i32
    %c0_i32_1 = arith.constant 0 : i32
    return %c0_i32, %c0_i32_0 : i32, i32
  }
  func.func @transform_1(%arg0: i32) -> (i32, i32) {
    %c0_i32 = arith.constant 0 : i32
    %c0_i32_0 = arith.constant 0 : i32
    %c0_i32_1 = arith.constant 0 : i32
    return %c0_i32, %c0_i32_0 : i32, i32
  }
  func.func @transform_2(%arg0: i32) -> (i32, i32) {
    %c0_i32 = arith.constant 0 : i32
    %c0_i32_0 = arith.constant 0 : i32
    %c0_i32_1 = arith.constant 0 : i32
    return %c0_i32, %c0_i32_0 : i32, i32
  }
  func.func @transform_3(%arg0: i32) -> (i32, i32) {
    %c0_i32 = arith.constant 0 : i32
    %c0_i32_0 = arith.constant 0 : i32
    %c0_i32_1 = arith.constant 0 : i32
    return %c0_i32, %c0_i32_0 : i32, i32
  }
  func.func @transform_4(%arg0: i32) -> (i32, i32) {
    %c0_i32 = arith.constant 0 : i32
    %c0_i32_0 = arith.constant 0 : i32
    %c0_i32_1 = arith.constant 0 : i32
    return %c0_i32, %c0_i32_0 : i32, i32
  }
  func.func @transform_5(%arg0: i32) -> (i32, i32) {
    %c0_i32 = arith.constant 0 : i32
    %c0_i32_0 = arith.constant 0 : i32
    %c0_i32_1 = arith.constant 0 : i32
    return %c0_i32, %c0_i32_0 : i32, i32
  }
  func.func @transform_6(%arg0: i32) -> (i32, i32) {
    %c0_i32 = arith.constant 0 : i32
    %c0_i32_0 = arith.constant 0 : i32
    %c0_i32_1 = arith.constant 0 : i32
    return %c0_i32, %c0_i32_0 : i32, i32
  }
  func.func @transform_7(%arg0: i32) -> (i32, i32) {
    %c0_i32 = arith.constant 0 : i32
    %c0_i32_0 = arith.constant 0 : i32
    %c0_i32_1 = arith.constant 0 : i32
    return %c0_i32, %c0_i32_0 : i32, i32
  }
}

module attributes {stable_mosaic.version = 11 : i64} {
  func.func @conv_pool_kernel(%arg0: i32, %arg1: memref<1x4x72x36xf32, #tpu.memory_space<vmem>>, %arg2: memref<16x72xf32, #tpu.memory_space<vmem>>, %arg3: memref<16x1xf32, #tpu.memory_space<vmem>>, %arg4: memref<1x16x36xf32, #tpu.memory_space<vmem>>) attributes {dimension_semantics = [#tpu.dimension_semantics<parallel>], iteration_bounds = array<i64: 2>, scalar_prefetch = 0 : i64, scratch_operands = 0 : i64, tpu.core_type = #tpu.core_type<tc>, window_params = [{transform_indices = @transform_0, window_bounds = array<i64: 1, 4, 72, 36>}, {pipeline_mode = #tpu.pipeline_mode<synchronous>, transform_indices = @transform_1, window_bounds = array<i64: 16, 72>}, {pipeline_mode = #tpu.pipeline_mode<synchronous>, transform_indices = @transform_2, window_bounds = array<i64: 16, 1>}, {transform_indices = @transform_3, window_bounds = array<i64: 1, 16, 36>}]} {
    %c0 = arith.constant 0 : index
    %c0_0 = arith.constant 0 : index
    %0 = vector.load %arg2[%c0, %c0_0] : memref<16x72xf32, #tpu.memory_space<vmem>>, vector<16x72xf32>
    %c0_1 = arith.constant 0 : index
    %c0_2 = arith.constant 0 : index
    %c0_3 = arith.constant 0 : index
    %c0_4 = arith.constant 0 : index
    %1 = vector.load %arg1[%c0_1, %c0_2, %c0_3, %c0_4] : memref<1x4x72x36xf32, #tpu.memory_space<vmem>>, vector<1x1x72x36xf32>
    %2 = vector.shape_cast %1 : vector<1x1x72x36xf32> to vector<72x36xf32>
    %cst = arith.constant dense<0.000000e+00> : vector<16x36xf32>
    %3 = tpu.matmul %0, %2, %cst {dimension_numbers = #tpu.dot_dimension_numbers<[1], [0], [0], [1], [0, 0, 1, 1], [], []>} : vector<16x72xf32>, vector<72x36xf32>, vector<16x36xf32> -> vector<16x36xf32>
    %c0_5 = arith.constant 0 : index
    %c1 = arith.constant 1 : index
    %c0_6 = arith.constant 0 : index
    %c0_7 = arith.constant 0 : index
    %4 = vector.load %arg1[%c0_5, %c1, %c0_6, %c0_7] : memref<1x4x72x36xf32, #tpu.memory_space<vmem>>, vector<1x1x72x36xf32>
    %5 = vector.shape_cast %4 : vector<1x1x72x36xf32> to vector<72x36xf32>
    %cst_8 = arith.constant dense<0.000000e+00> : vector<16x36xf32>
    %6 = tpu.matmul %0, %5, %cst_8 {dimension_numbers = #tpu.dot_dimension_numbers<[1], [0], [0], [1], [0, 0, 1, 1], [], []>} : vector<16x72xf32>, vector<72x36xf32>, vector<16x36xf32> -> vector<16x36xf32>
    %7 = arith.maximumf %3, %6 : vector<16x36xf32>
    %c0_9 = arith.constant 0 : index
    %c2 = arith.constant 2 : index
    %c0_10 = arith.constant 0 : index
    %c0_11 = arith.constant 0 : index
    %8 = vector.load %arg1[%c0_9, %c2, %c0_10, %c0_11] : memref<1x4x72x36xf32, #tpu.memory_space<vmem>>, vector<1x1x72x36xf32>
    %9 = vector.shape_cast %8 : vector<1x1x72x36xf32> to vector<72x36xf32>
    %cst_12 = arith.constant dense<0.000000e+00> : vector<16x36xf32>
    %10 = tpu.matmul %0, %9, %cst_12 {dimension_numbers = #tpu.dot_dimension_numbers<[1], [0], [0], [1], [0, 0, 1, 1], [], []>} : vector<16x72xf32>, vector<72x36xf32>, vector<16x36xf32> -> vector<16x36xf32>
    %11 = arith.maximumf %7, %10 : vector<16x36xf32>
    %c0_13 = arith.constant 0 : index
    %c3 = arith.constant 3 : index
    %c0_14 = arith.constant 0 : index
    %c0_15 = arith.constant 0 : index
    %12 = vector.load %arg1[%c0_13, %c3, %c0_14, %c0_15] : memref<1x4x72x36xf32, #tpu.memory_space<vmem>>, vector<1x1x72x36xf32>
    %13 = vector.shape_cast %12 : vector<1x1x72x36xf32> to vector<72x36xf32>
    %cst_16 = arith.constant dense<0.000000e+00> : vector<16x36xf32>
    %14 = tpu.matmul %0, %13, %cst_16 {dimension_numbers = #tpu.dot_dimension_numbers<[1], [0], [0], [1], [0, 0, 1, 1], [], []>} : vector<16x72xf32>, vector<72x36xf32>, vector<16x36xf32> -> vector<16x36xf32>
    %15 = arith.maximumf %11, %14 : vector<16x36xf32>
    %c0_17 = arith.constant 0 : index
    %c0_18 = arith.constant 0 : index
    %16 = vector.load %arg3[%c0_17, %c0_18] : memref<16x1xf32, #tpu.memory_space<vmem>>, vector<16x1xf32>
    %17 = vector.broadcast %16 : vector<16x1xf32> to vector<16x36xf32>
    %18 = arith.addf %15, %17 : vector<16x36xf32>
    %cst_19 = arith.constant 0.000000e+00 : f32
    %19 = vector.broadcast %cst_19 : f32 to vector<16x36xf32>
    %20 = arith.maximumf %18, %19 : vector<16x36xf32>
    %c0_20 = arith.constant 0 : index
    %c0_21 = arith.constant 0 : index
    %c0_22 = arith.constant 0 : index
    %21 = vector.load %arg4[%c0_20, %c0_21, %c0_22] : memref<1x16x36xf32, #tpu.memory_space<vmem>>, vector<1x16x36xf32>
    %22 = vector.shape_cast %21 : vector<1x16x36xf32> to vector<16x36xf32>
    %23 = vector.shape_cast %20 : vector<16x36xf32> to vector<1x16x36xf32>
    tpu.vector_store %arg4[%c0_20, %c0_21, %c0_22], %23 {strides = array<i32>} : memref<1x16x36xf32, #tpu.memory_space<vmem>>, vector<1x16x36xf32>,
    return
  }
  func.func @transform_0(%arg0: i32) -> (i32, i32, i32, i32) {
    %c0_i32 = arith.constant 0 : i32
    %c0_i32_0 = arith.constant 0 : i32
    %c0_i32_1 = arith.constant 0 : i32
    %c0_i32_2 = arith.constant 0 : i32
    return %arg0, %c0_i32, %c0_i32_0, %c0_i32_1 : i32, i32, i32, i32
  }
  func.func @transform_1(%arg0: i32) -> (i32, i32) {
    %c0_i32 = arith.constant 0 : i32
    %c0_i32_0 = arith.constant 0 : i32
    %c0_i32_1 = arith.constant 0 : i32
    return %c0_i32, %c0_i32_0 : i32, i32
  }
  func.func @transform_2(%arg0: i32) -> (i32, i32) {
    %c0_i32 = arith.constant 0 : i32
    %c0_i32_0 = arith.constant 0 : i32
    %c0_i32_1 = arith.constant 0 : i32
    return %c0_i32, %c0_i32_0 : i32, i32
  }
  func.func @transform_3(%arg0: i32) -> (i32, i32, i32) {
    %c0_i32 = arith.constant 0 : i32
    %c0_i32_0 = arith.constant 0 : i32
    %c0_i32_1 = arith.constant 0 : i32
    return %arg0, %c0_i32, %c0_i32_0 : i32, i32, i32
  }
}

</mosaic_0001>

<bundles_post_ra>
// kernel: net_forward.4
= control target key start
LH: loop header
LB: loop body
LE: loop exit
PB: predicated region body
PF: predicated region fallthrough
CT: control target
= control target key end

     0   :  { %s1552_s12 = smov 0   ;;  %s2009_s0 = inlined_call_operand.vmem [shape: f32[2,4,25,900], index: 0, kind: input, shape index: {}]   ;;  %s2010_s1 = inlined_call_operand.vmem [shape: f32[16,25], index: 1, kind: input, shape index: {}]   ;;  %s2011_s2 = inlined_call_operand.vmem [shape: f32[16,1], index: 2, kind: input, shape index: {}]   ;;  %s2012_s3 = inlined_call_operand.vmem [shape: f32[2,16,900], index: 3, kind: output, shape index: {}]  }
   0x1 LB: > { %s1308_s13 = sadd.s32 4294967295, %s1529_s12   ;;  %p1312_p0 = scmp.ge.s32.totalorder %s1529_s12, 1  ;;  %s1529_s12 = sphi %s1552_s12, %s13_s12  }
   0x2   : > { %p137_p1 = scmp.lt.s32.totalorder %s1529_s12, 3 }
   0x4   : > { %p138_p2 = pnand %p1312_p0, %p137_p1 }
   0x5   : > { %p161_p3 = scmp.lt.s32.totalorder (!%p138_p2), %s1308_s13, 1 }
   0x6   : > { %141 = sbr.rel (%p138_p2) target bundleno = 284 (0x11c), region = 32 }
   0xb   : > { %s2014_s13 = smov (!%p161_p3, %s1308_s13), 1  ;;  %vm212_vm0 = vcmask 1040384   ;;  %v1591_v16 = vld [vmem:[%s2010_s1] sm:$0xff]  ;;  %vm205_vm1 = vcmask 203776   ;;  %v1620_v29 = vld [vmem:[%s2010_s1 + $0x8] sm:$0xff]  ;;  %vm1243_vm2 = vcmask 31744  }
   0xc   : > { %s1511_s14 = sshll.u32 %s2014_s13, 10  ;;  %s1512_s26 = sshll.u32 %s2014_s13, 7 }
   0xd   : > { %s1566_s17 = scalar_lea.vmem %s2009_s0, %s1511_s14  ;;  %s1942_s29 = scalar_lea.vmem %s2012_s3, %s1512_s26 }
   0xe   : > { %v197_v0 = vld [vmem:[%s1566_s17 + $0xc0] sm:$0x1]  ;;  %v198_v1 = vld [vmem:[%s1566_s17 + $0xc8] sm:$0x1]  ;;  %v199_v2 = vld [vmem:[%s1566_s17 + $0xd0] sm:$0x1] }
   0xf   : > { %1317 = vmatpush.msk.msra.mxu0 %vm212_vm0, %v197_v0  ;;  %1320 = vmatpush.msk.msra.mxu1 %vm212_vm0, %v198_v1  ;;  %v200_v3 = vld [vmem:[%s1566_s17 + $0xd8] sm:$0x1]  ;;  %v189_v4 = vld [vmem:[%s1566_s17 + $0x80] sm:$0xff]  ;;  %v190_v5 = vld [vmem:[%s1566_s17 + $0x88] sm:$0xff] }
  0x10   : > { %1323 = vmatpush.msk.msra.mxu2 %vm212_vm0, %v199_v2  ;;  %1326 = vmatpush.msk.msra.mxu3 %vm212_vm0, %v200_v3  ;;  %v191_v6 = vld [vmem:[%s1566_s17 + $0x90] sm:$0xff]  ;;  %v192_v7 = vld [vmem:[%s1566_s17 + $0x98] sm:$0xff]  ;;  %v181_v8 = vld [vmem:[%s1566_s17 + $0x40] sm:$0xff] }
  0x11   : > { %250 = vmatpush.msra.mxu0 %v189_v4  ;;  %273 = vmatpush.msra.mxu1 %v190_v5  ;;  %v182_v9 = vld [vmem:[%s1566_s17 + $0x48] sm:$0xff]  ;;  %v183_v10 = vld [vmem:[%s1566_s17 + $0x50] sm:$0xff]  ;;  %v184_v11 = vld [vmem:[%s1566_s17 + $0x58] sm:$0xff] }
  0x12   : > { %296 = vmatpush.msra.mxu2 %v191_v6  ;;  %319 = vmatpush.msra.mxu3 %v192_v7  ;;  %v173_v12 = vld [vmem:[%s1566_s17] sm:$0xff]  ;;  %v174_v13 = vld [vmem:[%s1566_s17 + $0x8] sm:$0xff]  ;;  %v175_v14 = vld [vmem:[%s1566_s17 + $0x10] sm:$0xff] }
  0x13   : > { %251 = vmatpush.msra.mxu0 %v181_v8  ;;  %274 = vmatpush.msra.mxu1 %v182_v9  ;;  %v176_v15 = vld [vmem:[%s1566_s17 + $0x18] sm:$0xff]  ;;  %v203_v17 = vld [vmem:[%s1566_s17 + $0xf0] sm:$0x1]  ;;  %v201_v19 = vld [vmem:[%s1566_s17 + $0xe0] sm:$0x1] }
  0x14   : > { %297 = vmatpush.msra.mxu2 %v183_v10  ;;  %320 = vmatpush.msra.mxu3 %v184_v11  ;;  %v204_v18 = vld [vmem:[%s1566_s17 + $0xf8] sm:$0x1]  ;;  %v202_v20 = vld [vmem:[%s1566_s17 + $0xe8] sm:$0x1]  ;;  %v195_v21 = vld [vmem:[%s1566_s17 + $0xb0] sm:$0xff] }
  0x15   : > { %252 = vmatpush.msra.mxu0 %v173_v12  ;;  %275 = vmatpush.msra.mxu1 %v174_v13  ;;  %v196_v22 = vld [vmem:[%s1566_s17 + $0xb8] sm:$0xff]  ;;  %v193_v23 = vld [vmem:[%s1566_s17 + $0xa0] sm:$0xff]  ;;  %v194_v24 = vld [vmem:[%s1566_s17 + $0xa8] sm:$0xff] }
  0x16   : > { %298 = vmatpush.msra.mxu2 %v175_v14  ;;  %321 = vmatpush.msra.mxu3 %v176_v15  ;;  %v187_v25 = vld [vmem:[%s1566_s17 + $0x70] sm:$0xff]  ;;  %v188_v26 = vld [vmem:[%s1566_s17 + $0x78] sm:$0xff]  ;;  %v185_v27 = vld [vmem:[%s1566_s17 + $0x60] sm:$0xff] }
  0x17   : > { %1318 = vmatmul.msk.f32.vlgmr.msra.gmra.mxu0 %vm205_vm1, %v1591_v16  ;;  %1321 = vmatmul.msk.f32.vlgmr.msra.gmra.mxu1 %vm205_vm1, %v1591_v16  ;;  %v186_v28 = vld [vmem:[%s1566_s17 + $0x68] sm:$0xff]  ;;  %v179_v30 = vld [vmem:[%s1566_s17 + $0x30] sm:$0xff]  ;;  %v180_v31 = vld [vmem:[%s1566_s17 + $0x38] sm:$0xff] }
  0x18   : > { %1324 = vmatmul.msk.f32.vlgmr.msra.gmra.mxu2 %vm205_vm1, %v1591_v16  ;;  %1327 = vmatmul.msk.f32.vlgmr.msra.gmra.mxu3 %vm205_vm1, %v1591_v16  ;;  %v177_v32 = vld [vmem:[%s1566_s17 + $0x20] sm:$0xff]  ;;  %v178_v33 = vld [vmem:[%s1566_s17 + $0x28] sm:$0xff]  ;;  %v1367_v34 = vld [vmem:[%s1566_s17 + $0x1d0] sm:$0x1] }
  0x19   : > { %1335 = vmatpush.msk.msrb.mxu2 %vm212_vm0, %v203_v17  ;;  %1338 = vmatpush.msk.msrb.mxu3 %vm212_vm0, %v204_v18  ;;  %v1368_v35 = vld [vmem:[%s1566_s17 + $0x1d8] sm:$0x1]  ;;  %v1365_v36 = vld [vmem:[%s1566_s17 + $0x1c0] sm:$0x1]  ;;  %v1366_v37 = vld [vmem:[%s1566_s17 + $0x1c8] sm:$0x1] }
  0x1a   : > { %1329 = vmatpush.msk.msrb.mxu0 %vm212_vm0, %v201_v19  ;;  %1332 = vmatpush.msk.msrb.mxu1 %vm212_vm0, %v202_v20  ;;  %v1359_v38 = vld [vmem:[%s1566_s17 + $0x190] sm:$0xff]  ;;  %v1360_v39 = vld [vmem:[%s1566_s17 + $0x198] sm:$0xff]  ;;  %v1357_v40 = vld [vmem:[%s1566_s17 + $0x180] sm:$0xff] }
  0x1b   : > { %388 = vmatpush.msrb.mxu2 %v195_v21  ;;  %411 = vmatpush.msrb.mxu3 %v196_v22  ;;  %v1358_v41 = vld [vmem:[%s1566_s17 + $0x188] sm:$0xff]  ;;  %v1351_v42 = vld [vmem:[%s1566_s17 + $0x150] sm:$0xff]  ;;  %v1352_v43 = vld [vmem:[%s1566_s17 + $0x158] sm:$0xff] }
  0x1c   : > { %342 = vmatpush.msrb.mxu0 %v193_v23  ;;  %365 = vmatpush.msrb.mxu1 %v194_v24  ;;  %v1349_v44 = vld [vmem:[%s1566_s17 + $0x140] sm:$0xff]  ;;  %v1350_v45 = vld [vmem:[%s1566_s17 + $0x148] sm:$0xff]  ;;  %v1343_v46 = vld [vmem:[%s1566_s17 + $0x110] sm:$0xff] }
  0x1d   : > { %389 = vmatpush.msrb.mxu2 %v187_v25  ;;  %412 = vmatpush.msrb.mxu3 %v188_v26  ;;  %v1344_v47 = vld [vmem:[%s1566_s17 + $0x118] sm:$0xff]  ;;  %v1341_v48 = vld [vmem:[%s1566_s17 + $0x100] sm:$0xff]  ;;  %v1342_v49 = vld [vmem:[%s1566_s17 + $0x108] sm:$0xff] }
  0x1e   : > { %343 = vmatpush.msrb.mxu0 %v185_v27  ;;  %366 = vmatpush.msrb.mxu1 %v186_v28  ;;  %v1371_v50 = vld [vmem:[%s1566_s17 + $0x1f0] sm:$0x1]  ;;  %v1372_v51 = vld [vmem:[%s1566_s17 + $0x1f8] sm:$0x1]  ;;  %v1369_v52 = vld [vmem:[%s1566_s17 + $0x1e0] sm:$0x1] }
  0x1f   : > { %1319 = vmatmul.msk.f32.gmra.mxu0 %vm205_vm1, %v1620_v29  ;;  %1322 = vmatmul.msk.f32.gmra.mxu1 %vm205_vm1, %v1620_v29  ;;  %v1370_v53 = vld [vmem:[%s1566_s17 + $0x1e8] sm:$0x1]  ;;  %v1363_v54 = vld [vmem:[%s1566_s17 + $0x1b0] sm:$0xff]  ;;  %v1364_v55 = vld [vmem:[%s1566_s17 + $0x1b8] sm:$0xff] }
  0x20   : > { %1325 = vmatmul.msk.f32.gmra.mxu2 %vm205_vm1, %v1620_v29  ;;  %1328 = vmatmul.msk.f32.gmra.mxu3 %vm205_vm1, %v1620_v29  ;;  %v1361_v56 = vld [vmem:[%s1566_s17 + $0x1a0] sm:$0xff]  ;;  %v1362_v57 = vld [vmem:[%s1566_s17 + $0x1a8] sm:$0xff]  ;;  %v1355_v58 = vld [vmem:[%s1566_s17 + $0x170] sm:$0xff] }
  0x21   : > { %390 = vmatpush.msrb.mxu2 %v179_v30  ;;  %413 = vmatpush.msrb.mxu3 %v180_v31  ;;  %v1356_v59 = vld [vmem:[%s1566_s17 + $0x178] sm:$0xff]  ;;  %v1353_v60 = vld [vmem:[%s1566_s17 + $0x160] sm:$0xff]  ;;  %v1354_v61 = vld [vmem:[%s1566_s17 + $0x168] sm:$0xff] }
  0x22   : > { %344 = vmatpush.msrb.mxu0 %v177_v32  ;;  %367 = vmatpush.msrb.mxu1 %v178_v33  ;;  %v1347_v62 = vld [vmem:[%s1566_s17 + $0x130] sm:$0xff]  ;;  %v1348_v63 = vld [vmem:[%s1566_s17 + $0x138] sm:$0xff]  ;;  %v1345_v0 = vld [vmem:[%s1566_s17 + $0x120] sm:$0xff] }
  0x23   : > { %1379 = vmatpush.msk.msra.mxu2 %vm212_vm0, %v1367_v34  ;;  %1382 = vmatpush.msk.msra.mxu3 %vm212_vm0, %v1368_v35  ;;  %v1346_v1 = vld [vmem:[%s1566_s17 + $0x128] sm:$0xff]  ;;  %v1423_v2 = vld [vmem:[%s1566_s17 + $0x2d0] sm:$0x1]  ;;  %v1424_v3 = vld [vmem:[%s1566_s17 + $0x2d8] sm:$0x1] }
  0x24   : > { %1373 = vmatpush.msk.msra.mxu0 %vm212_vm0, %v1365_v36  ;;  %1376 = vmatpush.msk.msra.mxu1 %vm212_vm0, %v1366_v37  ;;  %v1421_v4 = vld [vmem:[%s1566_s17 + $0x2c0] sm:$0x1]  ;;  %v1422_v5 = vld [vmem:[%s1566_s17 + $0x2c8] sm:$0x1]  ;;  %v1415_v6 = vld [vmem:[%s1566_s17 + $0x290] sm:$0xff] }
  0x25   : > { %537 = vmatpush.msra.mxu2 %v1359_v38  ;;  %560 = vmatpush.msra.mxu3 %v1360_v39  ;;  %v1416_v7 = vld [vmem:[%s1566_s17 + $0x298] sm:$0xff]  ;;  %v1413_v8 = vld [vmem:[%s1566_s17 + $0x280] sm:$0xff]  ;;  %v1414_v9 = vld [vmem:[%s1566_s17 + $0x288] sm:$0xff] }
  0x26   : > { %491 = vmatpush.msra.mxu0 %v1357_v40  ;;  %514 = vmatpush.msra.mxu1 %v1358_v41  ;;  %v1407_v10 = vld [vmem:[%s1566_s17 + $0x250] sm:$0xff]  ;;  %v1408_v11 = vld [vmem:[%s1566_s17 + $0x258] sm:$0xff]  ;;  %v1405_v12 = vld [vmem:[%s1566_s17 + $0x240] sm:$0xff] }
  0x27   : > { %1330 = vmatmul.msk.f32.vlgmr.msrb.gmra.mxu0 %vm205_vm1, %v1591_v16  ;;  %1333 = vmatmul.msk.f32.vlgmr.msrb.gmra.mxu1 %vm205_vm1, %v1591_v16  ;;  %v1406_v13 = vld [vmem:[%s1566_s17 + $0x248] sm:$0xff]  ;;  %v1399_v14 = vld [vmem:[%s1566_s17 + $0x210] sm:$0xff]  ;;  %v1400_v15 = vld [vmem:[%s1566_s17 + $0x218] sm:$0xff] }
  0x28   : > { %1336 = vmatmul.msk.f32.vlgmr.msrb.gmra.mxu2 %vm205_vm1, %v1591_v16  ;;  %1339 = vmatmul.msk.f32.vlgmr.msrb.gmra.mxu3 %vm205_vm1, %v1591_v16  ;;  %v1397_v17 = vld [vmem:[%s1566_s17 + $0x200] sm:$0xff]  ;;  %v1398_v18 = vld [vmem:[%s1566_s17 + $0x208] sm:$0xff]  ;;  %v1427_v19 = vld [vmem:[%s1566_s17 + $0x2f0] sm:$0x1] }
  0x29   : > { %538 = vmatpush.msra.mxu2 %v1351_v42  ;;  %561 = vmatpush.msra.mxu3 %v1352_v43  ;;  %v1428_v20 = vld [vmem:[%s1566_s17 + $0x2f8] sm:$0x1]  ;;  %v1425_v21 = vld [vmem:[%s1566_s17 + $0x2e0] sm:$0x1]  ;;  %v1426_v22 = vld [vmem:[%s1566_s17 + $0x2e8] sm:$0x1] }
  0x2a   : > { %492 = vmatpush.msra.mxu0 %v1349_v44  ;;  %515 = vmatpush.msra.mxu1 %v1350_v45  ;;  %v1419_v23 = vld [vmem:[%s1566_s17 + $0x2b0] sm:$0xff]  ;;  %v1420_v24 = vld [vmem:[%s1566_s17 + $0x2b8] sm:$0xff]  ;;  %v1417_v25 = vld [vmem:[%s1566_s17 + $0x2a0] sm:$0xff] }
  0x2b   : > { %539 = vmatpush.msra.mxu2 %v1343_v46  ;;  %562 = vmatpush.msra.mxu3 %v1344_v47  ;;  %v1418_v26 = vld [vmem:[%s1566_s17 + $0x2a8] sm:$0xff]  ;;  %v1411_v27 = vld [vmem:[%s1566_s17 + $0x270] sm:$0xff]  ;;  %v1412_v28 = vld [vmem:[%s1566_s17 + $0x278] sm:$0xff] }
  0x2c   : > { %493 = vmatpush.msra.mxu0 %v1341_v48  ;;  %516 = vmatpush.msra.mxu1 %v1342_v49  ;;  %v1409_v30 = vld [vmem:[%s1566_s17 + $0x260] sm:$0xff]  ;;  %v1410_v31 = vld [vmem:[%s1566_s17 + $0x268] sm:$0xff]  ;;  %v1403_v32 = vld [vmem:[%s1566_s17 + $0x230] sm:$0xff] }
  0x2d   : > { %1391 = vmatpush.msk.msrb.mxu2 %vm212_vm0, %v1371_v50  ;;  %1394 = vmatpush.msk.msrb.mxu3 %vm212_vm0, %v1372_v51  ;;  %v1404_v33 = vld [vmem:[%s1566_s17 + $0x238] sm:$0xff]  ;;  %v1401_v34 = vld [vmem:[%s1566_s17 + $0x220] sm:$0xff]  ;;  %v1402_v35 = vld [vmem:[%s1566_s17 + $0x228] sm:$0xff] }
  0x2e   : > { %1385 = vmatpush.msk.msrb.mxu0 %vm212_vm0, %v1369_v52  ;;  %1388 = vmatpush.msk.msrb.mxu1 %vm212_vm0, %v1370_v53  ;;  %v1479_v36 = vld [vmem:[%s1566_s17 + $0x3d0] sm:$0x1]  ;;  %v1480_v37 = vld [vmem:[%s1566_s17 + $0x3d8] sm:$0x1]  ;;  %v1477_v38 = vld [vmem:[%s1566_s17 + $0x3c0] sm:$0x1] }
  0x2f   : > { %1331 = vmatmul.msk.f32.gmra.mxu0 %vm205_vm1, %v1620_v29  ;;  %1334 = vmatmul.msk.f32.gmra.mxu1 %vm205_vm1, %v1620_v29  ;;  %v1478_v39 = vld [vmem:[%s1566_s17 + $0x3c8] sm:$0x1]  ;;  %v1471_v40 = vld [vmem:[%s1566_s17 + $0x390] sm:$0xff]  ;;  %v1472_v41 = vld [vmem:[%s1566_s17 + $0x398] sm:$0xff]  ;;  %v1531_v53 = vmov 0  }
  0x30   : > { %1337 = vmatmul.msk.f32.gmra.mxu2 %vm205_vm1, %v1620_v29  ;;  %1340 = vmatmul.msk.f32.gmra.mxu3 %vm205_vm1, %v1620_v29  ;;  %v1469_v42 = vld [vmem:[%s1566_s17 + $0x380] sm:$0xff]  ;;  %v1470_v43 = vld [vmem:[%s1566_s17 + $0x388] sm:$0xff]  ;;  %v1463_v44 = vld [vmem:[%s1566_s17 + $0x350] sm:$0xff] }
  0x31   : > { %629 = vmatpush.msrb.mxu2 %v1363_v54  ;;  %652 = vmatpush.msrb.mxu3 %v1364_v55  ;;  %v1464_v45 = vld [vmem:[%s1566_s17 + $0x358] sm:$0xff]  ;;  %v1461_v46 = vld [vmem:[%s1566_s17 + $0x340] sm:$0xff]  ;;  %v1462_v47 = vld [vmem:[%s1566_s17 + $0x348] sm:$0xff] }
  0x32   : > { %583 = vmatpush.msrb.mxu0 %v1361_v56  ;;  %606 = vmatpush.msrb.mxu1 %v1362_v57  ;;  %v1455_v48 = vld [vmem:[%s1566_s17 + $0x310] sm:$0xff]  ;;  %v1456_v49 = vld [vmem:[%s1566_s17 + $0x318] sm:$0xff]  ;;  %v1453_v50 = vld [vmem:[%s1566_s17 + $0x300] sm:$0xff] }
  0x33   : > { %630 = vmatpush.msrb.mxu2 %v1355_v58  ;;  %653 = vmatpush.msrb.mxu3 %v1356_v59  ;;  %v1454_v51 = vld [vmem:[%s1566_s17 + $0x308] sm:$0xff]  ;;  %v1192_v52 = vld [vmem:[%s2011_s2] sm:$0xff]  ;;  %v1483_v54 = vld [vmem:[%s1566_s17 + $0x3f0] sm:$0x1] }
  0x34   : > { %584 = vmatpush.msrb.mxu0 %v1353_v60  ;;  %607 = vmatpush.msrb.mxu1 %v1354_v61  ;;  %v1484_v55 = vld [vmem:[%s1566_s17 + $0x3f8] sm:$0x1]  ;;  %v1481_v56 = vld [vmem:[%s1566_s17 + $0x3e0] sm:$0x1]  ;;  %v1482_v57 = vld [vmem:[%s1566_s17 + $0x3e8] sm:$0x1] }
  0x35   : > { %631 = vmatpush.msrb.mxu2 %v1347_v62  ;;  %654 = vmatpush.msrb.mxu3 %v1348_v63  ;;  %v1475_v58 = vld [vmem:[%s1566_s17 + $0x3b0] sm:$0xff]  ;;  %v1476_v59 = vld [vmem:[%s1566_s17 + $0x3b8] sm:$0xff]  ;;  %v1473_v60 = vld [vmem:[%s1566_s17 + $0x3a0] sm:$0xff] }
  0x36   : > { %585 = vmatpush.msrb.mxu0 %v1345_v0  ;;  %608 = vmatpush.msrb.mxu1 %v1346_v1  ;;  %v1474_v61 = vld [vmem:[%s1566_s17 + $0x3a8] sm:$0xff]  ;;  %v1467_v62 = vld [vmem:[%s1566_s17 + $0x370] sm:$0xff]  ;;  %v1468_v63 = vld [vmem:[%s1566_s17 + $0x378] sm:$0xff] }
  0x37   : > { %1374 = vmatmul.msk.f32.vlgmr.msra.gmra.mxu0 %vm205_vm1, %v1591_v16  ;;  %1377 = vmatmul.msk.f32.vlgmr.msra.gmra.mxu1 %vm205_vm1, %v1591_v16  ;;  %v1465_v0 = vld [vmem:[%s1566_s17 + $0x360] sm:$0xff]  ;;  %v1466_v1 = vld [vmem:[%s1566_s17 + $0x368] sm:$0xff] }
  0x38   : > { %1380 = vmatmul.msk.f32.vlgmr.msra.gmra.mxu2 %vm205_vm1, %v1591_v16  ;;  %1383 = vmatmul.msk.f32.vlgmr.msra.gmra.mxu3 %vm205_vm1, %v1591_v16 }
  0x39   : > { %1435 = vmatpush.msk.msra.mxu2 %vm212_vm0, %v1423_v2  ;;  %1438 = vmatpush.msk.msra.mxu3 %vm212_vm0, %v1424_v3  ;;  %v1459_v2 = vld [vmem:[%s1566_s17 + $0x330] sm:$0xff]  ;;  %v1460_v3 = vld [vmem:[%s1566_s17 + $0x338] sm:$0xff] }
  0x3a   : > { %1429 = vmatpush.msk.msra.mxu0 %vm212_vm0, %v1421_v4  ;;  %1432 = vmatpush.msk.msra.mxu1 %vm212_vm0, %v1422_v5  ;;  %v1457_v4 = vld [vmem:[%s1566_s17 + $0x320] sm:$0xff]  ;;  %v1458_v5 = vld [vmem:[%s1566_s17 + $0x328] sm:$0xff] }
  0x3b   : > { %794 = vmatpush.msra.mxu2 %v1415_v6  ;;  %817 = vmatpush.msra.mxu3 %v1416_v7  ;;  %v1193_v6 = vld [vmem:[%s2011_s2 + $0x8] sm:$0xff] }
  0x3c   : > { %748 = vmatpush.msra.mxu0 %v1413_v8  ;;  %771 = vmatpush.msra.mxu1 %v1414_v9 }
  0x3d   : > { %795 = vmatpush.msra.mxu2 %v1407_v10  ;;  %818 = vmatpush.msra.mxu3 %v1408_v11 }
  0x3e   : > { %749 = vmatpush.msra.mxu0 %v1405_v12  ;;  %772 = vmatpush.msra.mxu1 %v1406_v13 }
  0x3f   : > { %1375 = vmatmul.msk.f32.gmra.mxu0 %vm205_vm1, %v1620_v29  ;;  %1378 = vmatmul.msk.f32.gmra.mxu1 %vm205_vm1, %v1620_v29 }
  0x40   : > { %1381 = vmatmul.msk.f32.gmra.mxu2 %vm205_vm1, %v1620_v29  ;;  %1384 = vmatmul.msk.f32.gmra.mxu3 %vm205_vm1, %v1620_v29 }
  0x41   : > { %796 = vmatpush.msra.mxu2 %v1399_v14  ;;  %819 = vmatpush.msra.mxu3 %v1400_v15 }
  0x42   : > { %750 = vmatpush.msra.mxu0 %v1397_v17  ;;  %773 = vmatpush.msra.mxu1 %v1398_v18 }
  0x43   : > { %1522 = vset.pattern.permute.xlu0 %v1531_v53 }
  0x44   : > { %1196 = vperm.xlu0 %1522, %v1192_v52  }
  0x47   : > { %1386 = vmatmul.msk.f32.vlgmr.msrb.gmra.mxu0 %vm205_vm1, %v1591_v16  ;;  %1389 = vmatmul.msk.f32.vlgmr.msrb.gmra.mxu1 %vm205_vm1, %v1591_v16 }
  0x48   : > { %1392 = vmatmul.msk.f32.vlgmr.msrb.gmra.mxu2 %vm205_vm1, %v1591_v16  ;;  %1395 = vmatmul.msk.f32.vlgmr.msrb.gmra.mxu3 %vm205_vm1, %v1591_v16 }
  0x49   : > { %1447 = vmatpush.msk.msrb.mxu2 %vm212_vm0, %v1427_v19  ;;  %1450 = vmatpush.msk.msrb.mxu3 %vm212_vm0, %v1428_v20 }
  0x4a   : > { %1441 = vmatpush.msk.msrb.mxu0 %vm212_vm0, %v1425_v21  ;;  %1444 = vmatpush.msk.msrb.mxu1 %vm212_vm0, %v1426_v22 }
  0x4b   : > { %886 = vmatpush.msrb.mxu2 %v1419_v23  ;;  %909 = vmatpush.msrb.mxu3 %v1420_v24 }
  0x4c   : > { %840 = vmatpush.msrb.mxu0 %v1417_v25  ;;  %863 = vmatpush.msrb.mxu1 %v1418_v26 }
  0x4d   : > { %887 = vmatpush.msrb.mxu2 %v1411_v27  ;;  %910 = vmatpush.msrb.mxu3 %v1412_v28 }
  0x4e   : > { %841 = vmatpush.msrb.mxu0 %v1409_v30  ;;  %864 = vmatpush.msrb.mxu1 %v1410_v31 }
  0x4f   : > { %1387 = vmatmul.msk.f32.gmra.mxu0 %vm205_vm1, %v1620_v29  ;;  %1390 = vmatmul.msk.f32.gmra.mxu1 %vm205_vm1, %v1620_v29 }
  0x50   : > { %1393 = vmatmul.msk.f32.gmra.mxu2 %vm205_vm1, %v1620_v29  ;;  %1396 = vmatmul.msk.f32.gmra.mxu3 %vm205_vm1, %v1620_v29 }
  0x51   : > { %888 = vmatpush.msrb.mxu2 %v1403_v32  ;;  %911 = vmatpush.msrb.mxu3 %v1404_v33 }
  0x52   : > { %842 = vmatpush.msrb.mxu0 %v1401_v34  ;;  %865 = vmatpush.msrb.mxu1 %v1402_v35 }
  0x53   : > { %1201 = vperm.xlu0 %1522, %v1193_v6  }
  0x57   : > { %1430 = vmatmul.msk.f32.vlgmr.msra.gmra.mxu0 %vm205_vm1, %v1591_v16  ;;  %1433 = vmatmul.msk.f32.vlgmr.msra.gmra.mxu1 %vm205_vm1, %v1591_v16 }
  0x58   : > { %1436 = vmatmul.msk.f32.vlgmr.msra.gmra.mxu2 %vm205_vm1, %v1591_v16  ;;  %1439 = vmatmul.msk.f32.vlgmr.msra.gmra.mxu3 %vm205_vm1, %v1591_v16 }
  0x59   : > { %1491 = vmatpush.msk.msra.mxu2 %vm212_vm0, %v1479_v36  ;;  %1494 = vmatpush.msk.msra.mxu3 %vm212_vm0, %v1480_v37 }
  0x5a   : > { %1485 = vmatpush.msk.msra.mxu0 %vm212_vm0, %v1477_v38  ;;  %1488 = vmatpush.msk.msra.mxu1 %vm212_vm0, %v1478_v39 }
  0x5b   : > { %1051 = vmatpush.msra.mxu2 %v1471_v40  ;;  %1074 = vmatpush.msra.mxu3 %v1472_v41 }
  0x5c   : > { %1005 = vmatpush.msra.mxu0 %v1469_v42  ;;  %1028 = vmatpush.msra.mxu1 %v1470_v43 }
  0x5d   : > { %1052 = vmatpush.msra.mxu2 %v1463_v44  ;;  %1075 = vmatpush.msra.mxu3 %v1464_v45 }
  0x5e   : > { %1006 = vmatpush.msra.mxu0 %v1461_v46  ;;  %1029 = vmatpush.msra.mxu1 %v1462_v47 }
  0x5f   : > { %1431 = vmatmul.msk.f32.gmra.mxu0 %vm205_vm1, %v1620_v29  ;;  %1434 = vmatmul.msk.f32.gmra.mxu1 %vm205_vm1, %v1620_v29 }
  0x60   : > { %1437 = vmatmul.msk.f32.gmra.mxu2 %vm205_vm1, %v1620_v29  ;;  %1440 = vmatmul.msk.f32.gmra.mxu3 %vm205_vm1, %v1620_v29 }
  0x61   : > { %1053 = vmatpush.msra.mxu2 %v1455_v48  ;;  %1076 = vmatpush.msra.mxu3 %v1456_v49 }
  0x62   : > { %1007 = vmatpush.msra.mxu0 %v1453_v50  ;;  %1030 = vmatpush.msra.mxu1 %v1454_v51 }
  0x67   : > { %1442 = vmatmul.msk.f32.vlgmr.msrb.gmra.mxu0 %vm205_vm1, %v1591_v16  ;;  %1445 = vmatmul.msk.f32.vlgmr.msrb.gmra.mxu1 %vm205_vm1, %v1591_v16 }
  0x68   : > { %1448 = vmatmul.msk.f32.vlgmr.msrb.gmra.mxu2 %vm205_vm1, %v1591_v16  ;;  %1451 = vmatmul.msk.f32.vlgmr.msrb.gmra.mxu3 %vm205_vm1, %v1591_v16 }
  0x69   : > { %1503 = vmatpush.msk.msrb.mxu2 %vm212_vm0, %v1483_v54  ;;  %1506 = vmatpush.msk.msrb.mxu3 %vm212_vm0, %v1484_v55 }
  0x6a   : > { %1497 = vmatpush.msk.msrb.mxu0 %vm212_vm0, %v1481_v56  ;;  %1500 = vmatpush.msk.msrb.mxu1 %vm212_vm0, %v1482_v57 }
  0x6b   : > { %1143 = vmatpush.msrb.mxu2 %v1475_v58  ;;  %1166 = vmatpush.msrb.mxu3 %v1476_v59 }
  0x6c   : > { %1097 = vmatpush.msrb.mxu0 %v1473_v60  ;;  %1120 = vmatpush.msrb.mxu1 %v1474_v61 }
  0x6d   : > { %1144 = vmatpush.msrb.mxu2 %v1467_v62  ;;  %1167 = vmatpush.msrb.mxu3 %v1468_v63 }
  0x6e   : > { %1098 = vmatpush.msrb.mxu0 %v1465_v0  ;;  %1121 = vmatpush.msrb.mxu1 %v1466_v1 }
  0x6f   : > { %1443 = vmatmul.msk.f32.gmra.mxu0 %vm205_vm1, %v1620_v29  ;;  %1446 = vmatmul.msk.f32.gmra.mxu1 %vm205_vm1, %v1620_v29 }
  0x70   : > { %1449 = vmatmul.msk.f32.gmra.mxu2 %vm205_vm1, %v1620_v29  ;;  %1452 = vmatmul.msk.f32.gmra.mxu3 %vm205_vm1, %v1620_v29 }
  0x71   : > { %1145 = vmatpush.msrb.mxu2 %v1459_v2  ;;  %1168 = vmatpush.msrb.mxu3 %v1460_v3 }
  0x72   : > { %1099 = vmatpush.msrb.mxu0 %v1457_v4  ;;  %1122 = vmatpush.msrb.mxu1 %v1458_v5 }
  0x77   : > { %1486 = vmatmul.msk.f32.vlgmr.msra.gmra.mxu0 %vm205_vm1, %v1591_v16  ;;  %1489 = vmatmul.msk.f32.vlgmr.msra.gmra.mxu1 %vm205_vm1, %v1591_v16 }
  0x78   : > { %1492 = vmatmul.msk.f32.vlgmr.msra.gmra.mxu2 %vm205_vm1, %v1591_v16  ;;  %1495 = vmatmul.msk.f32.vlgmr.msra.gmra.mxu3 %vm205_vm1, %v1591_v16 }
  0x7f   : > { %1487 = vmatmul.msk.f32.gmra.mxu0 %vm205_vm1, %v1620_v29  ;;  %1490 = vmatmul.msk.f32.gmra.mxu1 %vm205_vm1, %v1620_v29 }
  0x80   : > { %1493 = vmatmul.msk.f32.gmra.mxu2 %vm205_vm1, %v1620_v29  ;;  %1496 = vmatmul.msk.f32.gmra.mxu3 %vm205_vm1, %v1620_v29 }
  0x87   : > { %1498 = vmatmul.msk.f32.vlgmr.msrb.gmra.mxu0 %vm205_vm1, %v1591_v16  ;;  %1501 = vmatmul.msk.f32.vlgmr.msrb.gmra.mxu1 %vm205_vm1, %v1591_v16 }
  0x88   : > { %1504 = vmatmul.msk.f32.vlgmr.msrb.gmra.mxu2 %vm205_vm1, %v1591_v16  ;;  %1507 = vmatmul.msk.f32.vlgmr.msrb.gmra.mxu3 %vm205_vm1, %v1591_v16 }
  0x8f   : > { %1499 = vmatmul.msk.f32.gmra.mxu0 %vm205_vm1, %v1620_v29  ;;  %1502 = vmatmul.msk.f32.gmra.mxu1 %vm205_vm1, %v1620_v29 }
  0x90   : > { %1505 = vmatmul.msk.f32.gmra.mxu2 %vm205_vm1, %v1620_v29  ;;  %1508 = vmatmul.msk.f32.gmra.mxu3 %vm205_vm1, %v1620_v29 }
  0x94   : > { %v254_v7 = vpop.f32.mrf.mxu0  ;;  %v277_v8 = vpop.f32.mrf.mxu1 }
  0x9b   : > { %v1872_v9 = vpop.f32.mrf.mxu2  ;;  %v1874_v10 = vpop.f32.mrf.mxu3 }
  0x9c   : > { %v1876_v11 = vpop.f32.mrf.mxu0  ;;  %v1878_v16 = vpop.f32.mrf.mxu1 }
  0xa3   : > { %v1880_v12 = vpop.f32.mrf.mxu2  ;;  %v1882_v13 = vpop.f32.mrf.mxu3 }
  0xa4   : > { %v1884_v14 = vpop.f32.mrf.mxu0  ;;  %v1886_v15 = vpop.f32.mrf.mxu1 }
  0xab   : > { %v1888_v17 = vpop.f32.mrf.mxu2  ;;  %v1890_v29 = vpop.f32.mrf.mxu3 }
  0xac   : > { %v1892_v18 = vpop.f32.mrf.mxu0  ;;  %v1894_v19 = vpop.f32.mrf.mxu1 }
  0xb3   : > { %v1896_v20 = vpop.f32.mrf.mxu2  ;;  %v1898_v21 = vpop.f32.mrf.mxu3 }
  0xb4   : > { %v495_v22 = vpop.f32.mrf.mxu0  ;;  %v518_v23 = vpop.f32.mrf.mxu1 }
  0xb5   : > { %v662_v54 = vmax.f32 %v254_v7, %v495_v22  ;;  %v663_v55 = vmax.f32 %v277_v8, %v518_v23 }
  0xb6   : > { %v1928_v53 = vpop.permute.xlu0 %1196 }
  0xbb   : > { %v541_v24 = vpop.f32.mrf.mxu2  ;;  %v564_v25 = vpop.f32.mrf.mxu3 }
  0xbc   : > { %v498_v26 = vpop.f32.mrf.mxu0  ;;  %v521_v27 = vpop.f32.mrf.mxu1  ;;  %v664_v2 = vmax.f32 %v1872_v9, %v541_v24  ;;  %v665_v3 = vmax.f32 %v1874_v10, %v564_v25 }
  0xbd   : > { %v670_v4 = vmax.f32 %v1876_v11, %v498_v26  ;;  %v671_v5 = vmax.f32 %v1878_v16, %v521_v27 }
  0xc3   : > { %v1900_v28 = vpop.f32.mrf.mxu2  ;;  %v1902_v30 = vpop.f32.mrf.mxu3 }
  0xc4   : > { %v1904_v31 = vpop.f32.mrf.mxu0  ;;  %v1906_v32 = vpop.f32.mrf.mxu1 }
  0xc5   : > { %v1946_v23 = vpop.permute.xlu0 %1201 }
  0xcb   : > { %v1908_v33 = vpop.f32.mrf.mxu2  ;;  %v1910_v34 = vpop.f32.mrf.mxu3 }
  0xcc   : > { %v1912_v35 = vpop.f32.mrf.mxu0  ;;  %v1914_v36 = vpop.f32.mrf.mxu1 }
  0xd3   : > { %v1916_v37 = vpop.f32.mrf.mxu2  ;;  %v1918_v38 = vpop.f32.mrf.mxu3 }
  0xd4   : > { %v752_v39 = vpop.f32.mrf.mxu0  ;;  %v775_v40 = vpop.f32.mrf.mxu1 }
  0xd5   : > { %v919_v56 = vmax.f32 %v662_v54, %v752_v39  ;;  %v920_v57 = vmax.f32 %v663_v55, %v775_v40 }
  0xdb   : > { %v798_v41 = vpop.f32.mrf.mxu2  ;;  %v821_v42 = vpop.f32.mrf.mxu3 }
  0xdc   : > { %v755_v43 = vpop.f32.mrf.mxu0  ;;  %v778_v44 = vpop.f32.mrf.mxu1  ;;  %v921_v8 = vmax.f32 %v664_v2, %v798_v41  ;;  %v922_v22 = vmax.f32 %v665_v3, %v821_v42  ;;  %v672_v42 = vmax.f32 %v1880_v12, %v1900_v28 }
  0xdd   : > { %v927_v9 = vmax.f32 %v670_v4, %v755_v43  ;;  %v928_v24 = vmax.f32 %v671_v5, %v778_v44  ;;  %v673_v43 = vmax.f32 %v1882_v13, %v1902_v30 }
  0xe3   : > { %v801_v45 = vpop.f32.mrf.mxu2  ;;  %v824_v46 = vpop.f32.mrf.mxu3 }
  0xe4   : > { %v844_v47 = vpop.f32.mrf.mxu0  ;;  %v867_v48 = vpop.f32.mrf.mxu1 }
  0xeb   : > { %v1920_v49 = vpop.f32.mrf.mxu2  ;;  %v1922_v50 = vpop.f32.mrf.mxu3 }
  0xec   : > { %v1924_v51 = vpop.f32.mrf.mxu0  ;;  %v1926_v52 = vpop.f32.mrf.mxu1 }
  0xf3   : > { %v1930_v58 = vpop.f32.mrf.mxu2  ;;  %v1932_v59 = vpop.f32.mrf.mxu3 }
  0xf4   : > { %v1009_v60 = vpop.f32.mrf.mxu0  ;;  %v1032_v61 = vpop.f32.mrf.mxu1 }
  0xf5   : > { %v1176_v62 = vmax.f32 %v919_v56, %v1009_v60  ;;  %v1177_v63 = vmax.f32 %v920_v57, %v1032_v61  ;;  %v666_v60 = vmax.f32 %v1884_v14, %v1904_v31  ;;  %v667_v61 = vmax.f32 %v1886_v15, %v1906_v32 }
  0xf7   : > { %v1204_v0 = vadd.f32 %v1928_v53, %v1176_v62  ;;  %v1205_v1 = vadd.f32 %v1928_v53, %v1177_v63  ;;  %v923_v2 = vmax.f32 %v666_v60, %v844_v47  ;;  %v924_v12 = vmax.f32 %v667_v61, %v867_v48 }
  0xf8   : > { %v668_v47 = vmax.f32 %v1888_v17, %v1908_v33  ;;  %v669_v48 = vmax.f32 %v1890_v29, %v1910_v34 }
  0xf9   : > { %v1220_v6 = vmax.f32 %v1204_v0, 0.0  ;;  %v1221_v7 = vmax.f32 %v1205_v1, 0.0  ;;  %v929_v0 = vmax.f32 %v672_v42, %v801_v45  ;;  %v930_v1 = vmax.f32 %v673_v43, %v824_v46 }
  0xfb   : > { %1236 = vst [vmem:[%s1942_s29] sm:$0xff] %v1220_v6  ;;  %v1055_v10 = vpop.f32.mrf.mxu2  ;;  %v1078_v25 = vpop.f32.mrf.mxu3 }
  0xfc   : > { %1237 = vst [vmem:[%s1942_s29 + $0x8] sm:$0xff] %v1221_v7  ;;  %v1178_v39 = vmax.f32 %v921_v8, %v1055_v10  ;;  %v1179_v40 = vmax.f32 %v922_v22, %v1078_v25  ;;  %v1012_v54 = vpop.f32.mrf.mxu0  ;;  %v1035_v55 = vpop.f32.mrf.mxu1  ;;  %v674_v8 = vmax.f32 %v1892_v18, %v1912_v35  ;;  %v675_v22 = vmax.f32 %v1894_v19, %v1914_v36 }
  0xfd   : > { %v1184_v56 = vmax.f32 %v927_v9, %v1012_v54  ;;  %v1185_v11 = vmax.f32 %v928_v24, %v1035_v55  ;;  %v925_v10 = vmax.f32 %v668_v47, %v1920_v49  ;;  %v926_v25 = vmax.f32 %v669_v48, %v1922_v50 }
  0xfe   : > { %v1206_v16 = vadd.f32 %v1928_v53, %v1178_v39  ;;  %v1207_v26 = vadd.f32 %v1928_v53, %v1179_v40  ;;  %v931_v17 = vmax.f32 %v674_v8, %v1924_v51  ;;  %v932_v29 = vmax.f32 %v675_v22, %v1926_v52 }
  0xff   : > { %v1212_v27 = vadd.f32 %v1946_v23, %v1184_v56  ;;  %v1213_v41 = vadd.f32 %v1946_v23, %v1185_v11  ;;  %v676_v51 = vmax.f32 %v1896_v20, %v1916_v37  ;;  %v677_v55 = vmax.f32 %v1898_v21, %v1918_v38 }
 0x100   : > { %v1222_v44 = vmax.f32 %v1206_v16, 0.0  ;;  %v1223_v57 = vmax.f32 %v1207_v26, 0.0 }
 0x101   : > { %v1228_v62 = vmax.f32 %v1212_v27, 0.0  ;;  %v1229_v63 = vmax.f32 %v1213_v41, 0.0  ;;  %v934_v27 = vmax.f32 %v677_v55, %v1932_v59 }
 0x102   : > { %1238 = vst [vmem:[%s1942_s29 + $0x10] sm:$0xff] %v1222_v44 }
 0x103   : > { %1239 = vst [vmem:[%s1942_s29 + $0x18] sm:$0xff] %v1223_v57  ;;  %v1058_v28 = vpop.f32.mrf.mxu2  ;;  %v1081_v3 = vpop.f32.mrf.mxu3 }
 0x104   : > { %1245 = vst [vmem:[%s1942_s29 + $0x40] sm:$0xff] %v1228_v62  ;;  %v1186_v13 = vmax.f32 %v929_v0, %v1058_v28  ;;  %v1187_v30 = vmax.f32 %v930_v1, %v1081_v3  ;;  %v1101_v4 = vpop.f32.mrf.mxu0  ;;  %v1124_v5 = vpop.f32.mrf.mxu1 }
 0x105   : > { %1246 = vst [vmem:[%s1942_s29 + $0x48] sm:$0xff] %v1229_v63  ;;  %v1180_v14 = vmax.f32 %v923_v2, %v1101_v4  ;;  %v1181_v15 = vmax.f32 %v924_v12, %v1124_v5 }
 0x106   : > { %v1214_v31 = vadd.f32 %v1946_v23, %v1186_v13  ;;  %v1215_v32 = vadd.f32 %v1946_v23, %v1187_v30 }
 0x107   : > { %v1208_v45 = vadd.f32 %v1928_v53, %v1180_v14  ;;  %v1209_v46 = vadd.f32 %v1928_v53, %v1181_v15 }
 0x108   : > { %v1230_v6 = vmax.f32 %v1214_v31, 0.0  ;;  %v1231_v7 = vmax.f32 %v1215_v32, 0.0 }
 0x109   : > { %v1224_v9 = vmax.f32 %v1208_v45, 0.0  ;;  %v1225_v24 = vmax.f32 %v1209_v46, 0.0 }
 0x10a   : > { %1247 = vst [vmem:[%s1942_s29 + $0x50] sm:$0xff] %v1230_v6 }
 0x10b   : > { %1248 = vst [vmem:[%s1942_s29 + $0x58] sm:$0xff] %v1231_v7  ;;  %v1147_v33 = vpop.f32.mrf.mxu2  ;;  %v1170_v34 = vpop.f32.mrf.mxu3 }
 0x10c   : > { %1240 = vst [vmem:[%s1942_s29 + $0x20] sm:$0xff] %v1224_v9  ;;  %v1182_v18 = vmax.f32 %v925_v10, %v1147_v33  ;;  %v1183_v35 = vmax.f32 %v926_v25, %v1170_v34  ;;  %v1104_v39 = vpop.f32.mrf.mxu0  ;;  %v1127_v19 = vpop.f32.mrf.mxu1 }
 0x10d   : > { %1241 = vst [vmem:[%s1942_s29 + $0x28] sm:$0xff] %v1225_v24  ;;  %v1188_v36 = vmax.f32 %v931_v17, %v1104_v39  ;;  %v1189_v49 = vmax.f32 %v932_v29, %v1127_v19 }
 0x10e   : > { %v1210_v50 = vadd.f32 %v1928_v53, %v1182_v18  ;;  %v1211_v40 = vadd.f32 %v1928_v53, %v1183_v35  ;;  %v933_v53 = vmax.f32 %v676_v51, %v1930_v58 }
 0x10f   : > { %v1216_v52 = vadd.f32 %v1946_v23, %v1188_v36  ;;  %v1217_v54 = vadd.f32 %v1946_v23, %v1189_v49 }
 0x110   : > { %v1226_v56 = vmax.f32 %v1210_v50, 0.0  ;;  %v1227_v11 = vmax.f32 %v1211_v40, 0.0 }
 0x111   : > { %v1232_v16 = vmax.f32 %v1216_v52, 0.0  ;;  %v1233_v26 = vmax.f32 %v1217_v54, 0.0 }
 0x112   : > { %1242 = vst [vmem:[%s1942_s29 + $0x30] sm:$0xff] %v1226_v56 }
 0x113   : > { %1244 = vst.msk [vmem:[%s1942_s29 + $0x38] sm:$0xff] %vm1243_vm2, %v1227_v11  ;;  %v1150_v20 = vpop.f32.mrf.mxu2  ;;  %v1173_v37 = vpop.f32.mrf.mxu3 }
 0x114   : > { %1249 = vst [vmem:[%s1942_s29 + $0x60] sm:$0xff] %v1232_v16  ;;  %v1190_v41 = vmax.f32 %v933_v53, %v1150_v20  ;;  %v1191_v42 = vmax.f32 %v934_v27, %v1173_v37 }
 0x115   : > { %1250 = vst [vmem:[%s1942_s29 + $0x68] sm:$0xff] %v1233_v26 }
 0x116   : > { %v1218_v21 = vadd.f32 %v1946_v23, %v1190_v41  ;;  %v1219_v38 = vadd.f32 %v1946_v23, %v1191_v42 }
 0x118   : > { %v1234_v43 = vmax.f32 %v1218_v21, 0.0  ;;  %v1235_v44 = vmax.f32 %v1219_v38, 0.0 }
 0x11a   : > { %1251 = vst [vmem:[%s1942_s29 + $0x70] sm:$0xff] %v1234_v43 }
 0x11b   : > { %1252 = vst.msk [vmem:[%s1942_s29 + $0x78] sm:$0xff] %vm1243_vm2, %v1235_v44 }
 0x11c PF: > { %s13_s12 = sadd.s32 1, %s1529_s12  }
 0x11d   : > { %p10_p4 = scmp.ge.s32.totalorder %s13_s12, 4  }
 0x11f   :  { %12 = sbr.rel (!%p10_p4) target bundleno = 1 (0x1), region = 65 }

// kernel: net_forward.5
= control target key start
LH: loop header
LB: loop body
LE: loop exit
PB: predicated region body
PF: predicated region fallthrough
CT: control target
= control target key end

     0   :  { %s885_s12 = smov 0   ;;  %s1089_s0 = inlined_call_operand.vmem [shape: f32[2,4,144,196], index: 0, kind: input, shape index: {}]   ;;  %s1090_s1 = inlined_call_operand.vmem [shape: f32[8,144], index: 1, kind: input, shape index: {}]   ;;  %s1091_s2 = inlined_call_operand.vmem [shape: f32[8,1], index: 2, kind: input, shape index: {}]   ;;  %s1092_s3 = inlined_call_operand.vmem [shape: f32[2,8,196], index: 3, kind: output, shape index: {}]  }
   0x1 LB: > { %s718_s13 = sadd.s32 4294967295, %s862_s12   ;;  %p722_p0 = scmp.ge.s32.totalorder %s862_s12, 1  ;;  %s862_s12 = sphi %s885_s12, %s13_s12  }
   0x2   : > { %p137_p1 = scmp.lt.s32.totalorder %s862_s12, 3 }
   0x4   : > { %p138_p2 = pnand %p722_p0, %p137_p1 }
   0x5   : > { %p161_p3 = scmp.lt.s32.totalorder (!%p138_p2), %s718_s13, 1 }
   0x6   : > { %141 = sbr.rel (%p138_p2) target bundleno = 236 (0xec), region = 32 }
   0xb   : > { %s1094_s13 = smov (!%p161_p3, %s718_s13), 1  ;;  %v914_v10 = vld [vmem:[%s1090_s1 + $0x8] sm:$0xff]  ;;  %vm209_vm0 = vcmask 130048   ;;  %v974_v62 = vld [vmem:[%s1090_s1] sm:$0xff]  ;;  %vm661_vm1 = vcmask 556032  }
   0xc   : > { %s845_s14 = smul.u32 1152, %s1094_s13  ;;  %s844_s24 = sshll.u32 %s1094_s13, 4 }
   0xd   : > { %s170_s27 = scalar_lea.vmem %s1092_s3, %s844_s24 }
   0xe   : > { %s899_s17 = scalar_lea.vmem %s1089_s0, %s845_s14 }
   0xf   : > { %v203_v0 = vld [vmem:[%s899_s17 + $0xf0] sm:$0xff]  ;;  %v208_v2 = vld [vmem:[%s899_s17 + $0x118] sm:$0xff]  ;;  %v201_v3 = vld [vmem:[%s899_s17 + $0xe0] sm:$0xff] }
  0x10   : > { %v207_v1 = vld [vmem:[%s899_s17 + $0x110] sm:$0xff]  ;;  %213 = vmatpush.msra.mxu0 %v203_v0  ;;  %v205_v4 = vld [vmem:[%s899_s17 + $0x100] sm:$0xff]  ;;  %v206_v5 = vld [vmem:[%s899_s17 + $0x108] sm:$0xff]  ;;  %287 = vmatpush.msra.mxu3 %v208_v2 }
  0x11   : > { %247 = vmatpush.msra.mxu2 %v207_v1  ;;  %v204_v6 = vld [vmem:[%s899_s17 + $0xf8] sm:$0xff]  ;;  %v762_v7 = vld [vmem:[%s899_s17 + $0x230] sm:$0xff]  ;;  %v202_v9 = vld [vmem:[%s899_s17 + $0xe8] sm:$0xff] }
  0x12   : > { %v199_v8 = vld [vmem:[%s899_s17 + $0xd0] sm:$0xff]  ;;  %214 = vmatpush.msra.mxu0 %v201_v3  ;;  %288 = vmatpush.msra.mxu3 %v206_v5  ;;  %v760_v11 = vld [vmem:[%s899_s17 + $0x220] sm:$0xff]  ;;  %v759_v13 = vld [vmem:[%s899_s17 + $0x218] sm:$0xff] }
  0x13   : > { %248 = vmatpush.msra.mxu2 %v205_v4  ;;  %v197_v12 = vld [vmem:[%s899_s17 + $0xc0] sm:$0xff]  ;;  %v200_v14 = vld [vmem:[%s899_s17 + $0xd8] sm:$0xff]  ;;  %727 = vmatmul.msk.f32.vlgmr.msra.gmra.mxu3 %vm209_vm0, %v914_v10  ;;  %v758_v15 = vld [vmem:[%s899_s17 + $0x210] sm:$0xff] }
  0x14   : > { %364 = vmatpush.msrb.mxu3 %v762_v7  ;;  %215 = vmatpush.msra.mxu0 %v199_v8  ;;  %v195_v16 = vld [vmem:[%s899_s17 + $0xb0] sm:$0xff]  ;;  %v757_v17 = vld [vmem:[%s899_s17 + $0x208] sm:$0xff]  ;;  %v756_v19 = vld [vmem:[%s899_s17 + $0x200] sm:$0xff] }
  0x15   : > { %253 = vmatpush.msrb.mxu2 %v204_v6  ;;  %v198_v18 = vld [vmem:[%s899_s17 + $0xc8] sm:$0xff]  ;;  %v193_v20 = vld [vmem:[%s899_s17 + $0xa0] sm:$0xff]  ;;  %330 = vmatpush.msra.mxu1 %v758_v15  ;;  %v755_v21 = vld [vmem:[%s899_s17 + $0x1f8] sm:$0xff] }
  0x16   : > { %365 = vmatpush.msrb.mxu3 %v760_v11  ;;  %216 = vmatpush.msra.mxu0 %v197_v12  ;;  %v196_v22 = vld [vmem:[%s899_s17 + $0xb8] sm:$0xff]  ;;  %v754_v23 = vld [vmem:[%s899_s17 + $0x1f0] sm:$0xff]  ;;  %v753_v25 = vld [vmem:[%s899_s17 + $0x1e8] sm:$0xff] }
  0x17   : > { %254 = vmatpush.msrb.mxu2 %v202_v9  ;;  %v191_v24 = vld [vmem:[%s899_s17 + $0x90] sm:$0xff]  ;;  %331 = vmatpush.msra.mxu1 %v756_v19  ;;  %v194_v26 = vld [vmem:[%s899_s17 + $0xa8] sm:$0xff]  ;;  %v752_v27 = vld [vmem:[%s899_s17 + $0x1e0] sm:$0xff] }
  0x18   : > { %370 = vmatpush.msra.mxu3 %v759_v13  ;;  %217 = vmatpush.msra.mxu0 %v195_v16  ;;  %v189_v28 = vld [vmem:[%s899_s17 + $0x80] sm:$0xff]  ;;  %v751_v29 = vld [vmem:[%s899_s17 + $0x1d8] sm:$0xff]  ;;  %v750_v31 = vld [vmem:[%s899_s17 + $0x1d0] sm:$0xff] }
  0x19   : > { %255 = vmatpush.msrb.mxu2 %v200_v14  ;;  %332 = vmatpush.msra.mxu1 %v754_v23  ;;  %v192_v30 = vld [vmem:[%s899_s17 + $0x98] sm:$0xff]  ;;  %v187_v32 = vld [vmem:[%s899_s17 + $0x70] sm:$0xff]  ;;  %v749_v33 = vld [vmem:[%s899_s17 + $0x1c8] sm:$0xff] }
  0x1a   : > { %371 = vmatpush.msra.mxu3 %v757_v17  ;;  %218 = vmatpush.msra.mxu0 %v193_v20  ;;  %v190_v34 = vld [vmem:[%s899_s17 + $0x88] sm:$0xff]  ;;  %v748_v35 = vld [vmem:[%s899_s17 + $0x1c0] sm:$0xff]  ;;  %v747_v37 = vld [vmem:[%s899_s17 + $0x1b8] sm:$0xff] }
  0x1b   : > { %256 = vmatpush.msrb.mxu2 %v198_v18  ;;  %333 = vmatpush.msra.mxu1 %v752_v27  ;;  %v185_v36 = vld [vmem:[%s899_s17 + $0x60] sm:$0xff]  ;;  %v188_v38 = vld [vmem:[%s899_s17 + $0x78] sm:$0xff]  ;;  %v746_v39 = vld [vmem:[%s899_s17 + $0x1b0] sm:$0xff] }
  0x1c   : > { %372 = vmatpush.msra.mxu3 %v755_v21  ;;  %219 = vmatpush.msra.mxu0 %v191_v24  ;;  %v183_v40 = vld [vmem:[%s899_s17 + $0x50] sm:$0xff]  ;;  %v745_v41 = vld [vmem:[%s899_s17 + $0x1a8] sm:$0xff]  ;;  %v744_v43 = vld [vmem:[%s899_s17 + $0x1a0] sm:$0xff] }
  0x1d   : > { %257 = vmatpush.msrb.mxu2 %v196_v22  ;;  %334 = vmatpush.msra.mxu1 %v750_v31  ;;  %v186_v42 = vld [vmem:[%s899_s17 + $0x68] sm:$0xff]  ;;  %v181_v44 = vld [vmem:[%s899_s17 + $0x40] sm:$0xff]  ;;  %v743_v45 = vld [vmem:[%s899_s17 + $0x198] sm:$0xff] }
  0x1e   : > { %373 = vmatpush.msra.mxu3 %v753_v25  ;;  %220 = vmatpush.msra.mxu0 %v189_v28  ;;  %v184_v46 = vld [vmem:[%s899_s17 + $0x58] sm:$0xff]  ;;  %v742_v47 = vld [vmem:[%s899_s17 + $0x190] sm:$0xff]  ;;  %v741_v49 = vld [vmem:[%s899_s17 + $0x188] sm:$0xff] }
  0x1f   : > { %258 = vmatpush.msrb.mxu2 %v194_v26  ;;  %335 = vmatpush.msra.mxu1 %v748_v35  ;;  %v179_v48 = vld [vmem:[%s899_s17 + $0x30] sm:$0xff]  ;;  %v182_v50 = vld [vmem:[%s899_s17 + $0x48] sm:$0xff]  ;;  %v740_v51 = vld [vmem:[%s899_s17 + $0x180] sm:$0xff] }
  0x20   : > { %374 = vmatpush.msra.mxu3 %v751_v29  ;;  %221 = vmatpush.msra.mxu0 %v187_v32  ;;  %v177_v52 = vld [vmem:[%s899_s17 + $0x20] sm:$0xff]  ;;  %v739_v53 = vld [vmem:[%s899_s17 + $0x178] sm:$0xff]  ;;  %v738_v55 = vld [vmem:[%s899_s17 + $0x170] sm:$0xff] }
  0x21   : > { %259 = vmatpush.msrb.mxu2 %v192_v30  ;;  %336 = vmatpush.msra.mxu1 %v746_v39  ;;  %v180_v54 = vld [vmem:[%s899_s17 + $0x38] sm:$0xff]  ;;  %v175_v56 = vld [vmem:[%s899_s17 + $0x10] sm:$0xff]  ;;  %v737_v57 = vld [vmem:[%s899_s17 + $0x168] sm:$0xff] }
  0x22   : > { %375 = vmatpush.msra.mxu3 %v749_v33  ;;  %222 = vmatpush.msra.mxu0 %v185_v36  ;;  %v178_v58 = vld [vmem:[%s899_s17 + $0x28] sm:$0xff]  ;;  %v736_v59 = vld [vmem:[%s899_s17 + $0x160] sm:$0xff]  ;;  %v735_v61 = vld [vmem:[%s899_s17 + $0x158] sm:$0xff] }
  0x23   : > { %260 = vmatpush.msrb.mxu2 %v190_v34  ;;  %337 = vmatpush.msra.mxu1 %v744_v43  ;;  %v173_v60 = vld [vmem:[%s899_s17] sm:$0xff]  ;;  %v176_v63 = vld [vmem:[%s899_s17 + $0x18] sm:$0xff]  ;;  %v734_v0 = vld [vmem:[%s899_s17 + $0x150] sm:$0xff] }
  0x24   : > { %376 = vmatpush.msra.mxu3 %v747_v37  ;;  %223 = vmatpush.msra.mxu0 %v183_v40  ;;  %v733_v1 = vld [vmem:[%s899_s17 + $0x148] sm:$0xff]  ;;  %v763_v2 = vld [vmem:[%s899_s17 + $0x238] sm:$0xff]  ;;  %v732_v4 = vld [vmem:[%s899_s17 + $0x140] sm:$0xff] }
  0x25   : > { %261 = vmatpush.msrb.mxu2 %v188_v38  ;;  %338 = vmatpush.msra.mxu1 %v742_v47  ;;  %v174_v3 = vld [vmem:[%s899_s17 + $0x8] sm:$0xff]  ;;  %v731_v5 = vld [vmem:[%s899_s17 + $0x138] sm:$0xff]  ;;  %v796_v6 = vld [vmem:[%s899_s17 + $0x330] sm:$0xff] }
  0x26   : > { %377 = vmatpush.msra.mxu3 %v745_v41  ;;  %224 = vmatpush.msra.mxu0 %v181_v44  ;;  %v730_v7 = vld [vmem:[%s899_s17 + $0x130] sm:$0xff]  ;;  %v761_v8 = vld [vmem:[%s899_s17 + $0x228] sm:$0xff]  ;;  %v794_v11 = vld [vmem:[%s899_s17 + $0x320] sm:$0xff] }
  0x27   : > { %262 = vmatpush.msrb.mxu2 %v186_v42  ;;  %339 = vmatpush.msra.mxu1 %v740_v51  ;;  %v729_v9 = vld [vmem:[%s899_s17 + $0x128] sm:$0xff]  ;;  %v800_v12 = vld [vmem:[%s899_s17 + $0x350] sm:$0xff]  ;;  %v728_v13 = vld [vmem:[%s899_s17 + $0x120] sm:$0xff] }
  0x28   : > { %378 = vmatpush.msra.mxu3 %v743_v45  ;;  %225 = vmatpush.msra.mxu0 %v179_v48  ;;  %v834_v14 = vld [vmem:[%s899_s17 + $0x450] sm:$0xff]  ;;  %v798_v16 = vld [vmem:[%s899_s17 + $0x340] sm:$0xff]  ;;  %v797_v18 = vld [vmem:[%s899_s17 + $0x338] sm:$0xff] }
  0x29   : > { %263 = vmatpush.msrb.mxu2 %v184_v46  ;;  %340 = vmatpush.msra.mxu1 %v738_v55  ;;  %v792_v15 = vld [vmem:[%s899_s17 + $0x310] sm:$0xff]  ;;  %v832_v17 = vld [vmem:[%s899_s17 + $0x440] sm:$0xff]  ;;  %v801_v20 = vld [vmem:[%s899_s17 + $0x358] sm:$0xff] }
  0x2a   : > { %379 = vmatpush.msra.mxu3 %v741_v49  ;;  %226 = vmatpush.msra.mxu0 %v177_v52  ;;  %v790_v19 = vld [vmem:[%s899_s17 + $0x300] sm:$0xff]  ;;  %v830_v21 = vld [vmem:[%s899_s17 + $0x430] sm:$0xff]  ;;  %v795_v22 = vld [vmem:[%s899_s17 + $0x328] sm:$0xff] }
  0x2b   : > { %264 = vmatpush.msrb.mxu2 %v182_v50  ;;  %341 = vmatpush.msra.mxu1 %v736_v59  ;;  %v788_v23 = vld [vmem:[%s899_s17 + $0x2f0] sm:$0xff]  ;;  %v828_v24 = vld [vmem:[%s899_s17 + $0x420] sm:$0xff]  ;;  %v799_v25 = vld [vmem:[%s899_s17 + $0x348] sm:$0xff] }
  0x2c   : > { %726 = vmatmul.msk.f32.vlgmr.msra.gmra.mxu2 %vm209_vm0, %v914_v10  ;;  %380 = vmatpush.msra.mxu3 %v739_v53  ;;  %v793_v26 = vld [vmem:[%s899_s17 + $0x318] sm:$0xff]  ;;  %v786_v27 = vld [vmem:[%s899_s17 + $0x2e0] sm:$0xff]  ;;  %v826_v28 = vld [vmem:[%s899_s17 + $0x410] sm:$0xff] }
  0x2d   : > { %265 = vmatpush.msrb.mxu2 %v180_v54  ;;  %227 = vmatpush.msra.mxu0 %v175_v56  ;;  %v838_v29 = vld [vmem:[%s899_s17 + $0x470] sm:$0xff]  ;;  %v791_v30 = vld [vmem:[%s899_s17 + $0x308] sm:$0xff]  ;;  %v824_v32 = vld [vmem:[%s899_s17 + $0x400] sm:$0xff] }
  0x2e   : > { %381 = vmatpush.msra.mxu3 %v737_v57  ;;  %342 = vmatpush.msra.mxu1 %v734_v0  ;;  %v784_v31 = vld [vmem:[%s899_s17 + $0x2d0] sm:$0xff]  ;;  %v836_v33 = vld [vmem:[%s899_s17 + $0x460] sm:$0xff]  ;;  %v789_v34 = vld [vmem:[%s899_s17 + $0x2f8] sm:$0xff] }
  0x2f   : > { %266 = vmatpush.msrb.mxu2 %v178_v58  ;;  %764 = vmatmul.msk.f32.vlgmr.msrb.gmra.mxu3 %vm209_vm0, %v914_v10  ;;  %v782_v35 = vld [vmem:[%s899_s17 + $0x2c0] sm:$0xff]  ;;  %v822_v36 = vld [vmem:[%s899_s17 + $0x3f0] sm:$0xff]  ;;  %v835_v37 = vld [vmem:[%s899_s17 + $0x458] sm:$0xff] }
  0x30   : > { %228 = vmatpush.msra.mxu0 %v173_v60  ;;  %382 = vmatpush.msra.mxu3 %v735_v61  ;;  %v787_v38 = vld [vmem:[%s899_s17 + $0x2e8] sm:$0xff]  ;;  %v780_v39 = vld [vmem:[%s899_s17 + $0x2b0] sm:$0xff]  ;;  %v820_v40 = vld [vmem:[%s899_s17 + $0x3e0] sm:$0xff] }
  0x31   : > { %229 = vmatmul.f32.vlgmr.msra.gmra.mxu0 %v974_v62  ;;  %267 = vmatpush.msrb.mxu2 %v176_v63  ;;  %v833_v41 = vld [vmem:[%s899_s17 + $0x448] sm:$0xff]  ;;  %v785_v42 = vld [vmem:[%s899_s17 + $0x2d8] sm:$0xff]  ;;  %v778_v43 = vld [vmem:[%s899_s17 + $0x2a0] sm:$0xff] }
  0x32   : > { %383 = vmatpush.msra.mxu3 %v733_v1  ;;  %404 = vmatpush.msrb.mxu0 %v763_v2  ;;  %v818_v44 = vld [vmem:[%s899_s17 + $0x3d0] sm:$0xff]  ;;  %v831_v45 = vld [vmem:[%s899_s17 + $0x438] sm:$0xff]  ;;  %v783_v46 = vld [vmem:[%s899_s17 + $0x2c8] sm:$0xff] }
  0x33   : > { %268 = vmatpush.msrb.mxu2 %v174_v3  ;;  %343 = vmatpush.msra.mxu1 %v732_v4  ;;  %v776_v47 = vld [vmem:[%s899_s17 + $0x290] sm:$0xff]  ;;  %v816_v48 = vld [vmem:[%s899_s17 + $0x3c0] sm:$0xff]  ;;  %v829_v49 = vld [vmem:[%s899_s17 + $0x428] sm:$0xff] }
  0x34   : > { %269 = vmatmul.f32.vlgmr.msrb.gmra.mxu2 %v974_v62  ;;  %384 = vmatpush.msra.mxu3 %v731_v5  ;;  %v781_v50 = vld [vmem:[%s899_s17 + $0x2b8] sm:$0xff]  ;;  %v774_v51 = vld [vmem:[%s899_s17 + $0x280] sm:$0xff]  ;;  %v814_v52 = vld [vmem:[%s899_s17 + $0x3b0] sm:$0xff] }
  0x35   : > { %449 = vmatpush.msra.mxu2 %v796_v6  ;;  %344 = vmatpush.msra.mxu1 %v730_v7  ;;  %v827_v53 = vld [vmem:[%s899_s17 + $0x418] sm:$0xff]  ;;  %v779_v54 = vld [vmem:[%s899_s17 + $0x2a8] sm:$0xff]  ;;  %v772_v55 = vld [vmem:[%s899_s17 + $0x270] sm:$0xff] }
  0x36   : > { %405 = vmatpush.msrb.mxu0 %v761_v8  ;;  %385 = vmatpush.msra.mxu3 %v729_v9  ;;  %v812_v56 = vld [vmem:[%s899_s17 + $0x3a0] sm:$0xff]  ;;  %v825_v57 = vld [vmem:[%s899_s17 + $0x408] sm:$0xff]  ;;  %v777_v58 = vld [vmem:[%s899_s17 + $0x298] sm:$0xff] }
  0x37   : > { %450 = vmatpush.msra.mxu2 %v794_v11  ;;  %345 = vmatpush.msra.mxu1 %v728_v13  ;;  %v770_v59 = vld [vmem:[%s899_s17 + $0x260] sm:$0xff]  ;;  %v810_v60 = vld [vmem:[%s899_s17 + $0x390] sm:$0xff]  ;;  %v823_v61 = vld [vmem:[%s899_s17 + $0x3f8] sm:$0xff] }
  0x38   : > { %483 = vmatpush.msra.mxu0 %v800_v12  ;;  %386 = vmatmul.f32.vlgmr.msra.gmra.mxu3 %v974_v62  ;;  %v775_v63 = vld [vmem:[%s899_s17 + $0x288] sm:$0xff]  ;;  %v768_v0 = vld [vmem:[%s899_s17 + $0x250] sm:$0xff]  ;;  %v773_v2 = vld [vmem:[%s899_s17 + $0x278] sm:$0xff] }
  0x39   : > { %568 = vmatpush.msrb.mxu3 %v834_v14  ;;  %346 = vmatmul.f32.vlgmr.msra.gmra.mxu1 %v974_v62  ;;  %v821_v1 = vld [vmem:[%s899_s17 + $0x3e8] sm:$0xff]  ;;  %v808_v3 = vld [vmem:[%s899_s17 + $0x380] sm:$0xff]  ;;  %v819_v5 = vld [vmem:[%s899_s17 + $0x3d8] sm:$0xff] }
  0x3a   : > { %451 = vmatpush.msra.mxu2 %v792_v15  ;;  %484 = vmatpush.msra.mxu0 %v798_v16  ;;  %v766_v4 = vld [vmem:[%s899_s17 + $0x240] sm:$0xff]  ;;  %v771_v6 = vld [vmem:[%s899_s17 + $0x268] sm:$0xff]  ;;  %v806_v7 = vld [vmem:[%s899_s17 + $0x370] sm:$0xff] }
  0x3b   : > { %765 = vmatmul.msk.f32.vlgmr.msrb.gmra.mxu0 %vm209_vm0, %v914_v10  ;;  %569 = vmatpush.msrb.mxu3 %v832_v17  ;;  %v839_v8 = vld [vmem:[%s899_s17 + $0x478] sm:$0xff]  ;;  %v817_v9 = vld [vmem:[%s899_s17 + $0x3c8] sm:$0xff]  ;;  %v804_v12 = vld [vmem:[%s899_s17 + $0x360] sm:$0xff] }
  0x3c   : > { %489 = vmatpush.msrb.mxu0 %v797_v18  ;;  %452 = vmatpush.msra.mxu2 %v790_v19  ;;  %v769_v11 = vld [vmem:[%s899_s17 + $0x258] sm:$0xff]  ;;  %v767_v14 = vld [vmem:[%s899_s17 + $0x248] sm:$0xff]  ;;  %v650_v18 = vld [vmem:[%s1091_s2] sm:$0xff] }
  0x3d   : > { %523 = vmatpush.msrb.mxu1 %v801_v20  ;;  %570 = vmatpush.msrb.mxu3 %v830_v21  ;;  %v815_v13 = vld [vmem:[%s899_s17 + $0x3b8] sm:$0xff]  ;;  %v837_v15 = vld [vmem:[%s899_s17 + $0x468] sm:$0xff]  ;;  %v864_v20 = vmov 0  }
  0x3e   : > { %490 = vmatpush.msrb.mxu0 %v795_v22  ;;  %453 = vmatpush.msra.mxu2 %v788_v23  ;;  %v813_v16 = vld [vmem:[%s899_s17 + $0x3a8] sm:$0xff]  ;;  %v811_v17 = vld [vmem:[%s899_s17 + $0x398] sm:$0xff] }
  0x3f   : > { %571 = vmatpush.msrb.mxu3 %v828_v24  ;;  %524 = vmatpush.msrb.mxu1 %v799_v25  ;;  %v809_v19 = vld [vmem:[%s899_s17 + $0x388] sm:$0xff]  ;;  %v807_v21 = vld [vmem:[%s899_s17 + $0x378] sm:$0xff] }
  0x40   : > { %491 = vmatpush.msrb.mxu0 %v793_v26  ;;  %454 = vmatpush.msra.mxu2 %v786_v27  ;;  %v805_v22 = vld [vmem:[%s899_s17 + $0x368] sm:$0xff] }
  0x41   : > { %572 = vmatpush.msrb.mxu3 %v826_v28  ;;  %602 = vmatpush.msra.mxu1 %v838_v29 }
  0x42   : > { %492 = vmatpush.msrb.mxu0 %v791_v30  ;;  %455 = vmatpush.msra.mxu2 %v784_v31 }
  0x43   : > { %573 = vmatpush.msrb.mxu3 %v824_v32  ;;  %603 = vmatpush.msra.mxu1 %v836_v33 }
  0x44   : > { %493 = vmatpush.msrb.mxu0 %v789_v34  ;;  %456 = vmatpush.msra.mxu2 %v782_v35 }
  0x45   : > { %803 = vmatmul.msk.f32.vlgmr.msrb.gmra.mxu1 %vm209_vm0, %v914_v10  ;;  %574 = vmatpush.msrb.mxu3 %v822_v36 }
  0x46   : > { %608 = vmatpush.msrb.mxu1 %v835_v37  ;;  %494 = vmatpush.msrb.mxu0 %v787_v38 }
  0x47   : > { %457 = vmatpush.msra.mxu2 %v780_v39  ;;  %575 = vmatpush.msrb.mxu3 %v820_v40 }
  0x48   : > { %609 = vmatpush.msrb.mxu1 %v833_v41  ;;  %495 = vmatpush.msrb.mxu0 %v785_v42 }
  0x49   : > { %458 = vmatpush.msra.mxu2 %v778_v43  ;;  %576 = vmatpush.msrb.mxu3 %v818_v44 }
  0x4a   : > { %610 = vmatpush.msrb.mxu1 %v831_v45  ;;  %496 = vmatpush.msrb.mxu0 %v783_v46 }
  0x4b   : > { %459 = vmatpush.msra.mxu2 %v776_v47  ;;  %577 = vmatpush.msrb.mxu3 %v816_v48 }
  0x4c   : > { %611 = vmatpush.msrb.mxu1 %v829_v49  ;;  %497 = vmatpush.msrb.mxu0 %v781_v50 }
  0x4d   : > { %460 = vmatpush.msra.mxu2 %v774_v51  ;;  %578 = vmatpush.msrb.mxu3 %v814_v52 }
  0x4e   : > { %612 = vmatpush.msrb.mxu1 %v827_v53  ;;  %498 = vmatpush.msrb.mxu0 %v779_v54 }
  0x4f   : > { %461 = vmatpush.msra.mxu2 %v772_v55  ;;  %579 = vmatpush.msrb.mxu3 %v812_v56 }
  0x50   : > { %613 = vmatpush.msrb.mxu1 %v825_v57  ;;  %499 = vmatpush.msrb.mxu0 %v777_v58 }
  0x51   : > { %462 = vmatpush.msra.mxu2 %v770_v59  ;;  %580 = vmatpush.msrb.mxu3 %v810_v60 }
  0x52   : > { %614 = vmatpush.msrb.mxu1 %v823_v61  ;;  %500 = vmatpush.msrb.mxu0 %v775_v63 }
  0x53   : > { %463 = vmatpush.msra.mxu2 %v768_v0  ;;  %802 = vmatmul.msk.f32.vlgmr.msra.gmra.mxu0 %vm209_vm0, %v914_v10 }
  0x54   : > { %615 = vmatpush.msrb.mxu1 %v821_v1  ;;  %501 = vmatpush.msrb.mxu0 %v773_v2 }
  0x55   : > { %581 = vmatpush.msrb.mxu3 %v808_v3  ;;  %464 = vmatpush.msra.mxu2 %v766_v4 }
  0x56   : > { %616 = vmatpush.msrb.mxu1 %v819_v5  ;;  %465 = vmatmul.f32.vlgmr.msra.gmra.mxu2 %v974_v62 }
  0x57   : > { %502 = vmatpush.msrb.mxu0 %v771_v6  ;;  %582 = vmatpush.msrb.mxu3 %v806_v7 }
  0x58   : > { %642 = vmatpush.msrb.mxu2 %v839_v8  ;;  %617 = vmatpush.msrb.mxu1 %v817_v9 }
  0x59   : > { %503 = vmatpush.msrb.mxu0 %v769_v11  ;;  %583 = vmatpush.msrb.mxu3 %v804_v12 }
  0x5a   : > { %584 = vmatmul.f32.vlgmr.msrb.gmra.mxu3 %v974_v62  ;;  %618 = vmatpush.msrb.mxu1 %v815_v13 }
  0x5b   : > { %504 = vmatpush.msrb.mxu0 %v767_v14  ;;  %643 = vmatpush.msrb.mxu2 %v837_v15 }
  0x5c   : > { %505 = vmatmul.f32.vlgmr.msrb.gmra.mxu0 %v974_v62  ;;  %619 = vmatpush.msrb.mxu1 %v813_v16 }
  0x5d   : > { %840 = vmatmul.msk.f32.vlgmr.msra.gmra.mxu1 %vm209_vm0, %v914_v10  ;;  %855 = vset.pattern.permute.xlu0 %v864_v20 }
  0x5e   : > { %620 = vmatpush.msrb.mxu1 %v811_v17  ;;  %841 = vmatmul.msk.f32.vlgmr.msrb.gmra.mxu2 %vm209_vm0, %v914_v10 }
  0x5f   : > { %653 = vperm.xlu0 %855, %v650_v18  }
  0x60   : > { %621 = vmatpush.msrb.mxu1 %v809_v19 }
  0x62   : > { %622 = vmatpush.msrb.mxu1 %v807_v21 }
  0x64   : > { %623 = vmatpush.msrb.mxu1 %v805_v22 }
  0x65   : > { %624 = vmatmul.f32.vlgmr.msrb.gmra.mxu1 %v974_v62 }
  0x96   : > { %v290_v24 = vpop.f32.mrf.mxu3 }
  0xae   : > { %v230_v23 = vpop.f32.mrf.mxu0 }
  0xaf   : > { %v250_v25 = vpop.f32.mrf.mxu2 }
  0xb0   : > { %v251_v10 = vadd.f32 %v250_v25, %v230_v23 }
  0xb2   : > { %v367_v28 = vpop.f32.mrf.mxu3 }
  0xb6   : > { %v347_v26 = vpop.f32.mrf.mxu1 }
  0xb7   : > { %v270_v29 = vpop.f32.mrf.mxu2  ;;  %v368_v33 = vadd.f32 %v367_v28, %v347_v26 }
  0xb8   : > { %v407_v27 = vpop.f32.mrf.mxu0  ;;  %v291_v42 = vadd.f32 %v290_v24, %v270_v29 }
  0xb9   : > { %v410_v35 = vmax.f32 %v251_v10, %v368_v33 }
  0xbb   : > { %v387_v32 = vpop.f32.mrf.mxu3 }
  0xbc   : > { %v408_v62 = vadd.f32 %v407_v27, %v387_v32 }
  0xbe   : > { %v411_v46 = vmax.f32 %v291_v42, %v408_v62 }
  0xc2   : > { %v526_v30 = vpop.f32.mrf.mxu1 }
  0xd0   : > { %v486_v31 = vpop.f32.mrf.mxu0 }
  0xd1   : > { %v654_v44 = vpop.permute.xlu0 %653 }
  0xd9   : > { %v466_v34 = vpop.f32.mrf.mxu2  ;;  %v506_v38 = vpop.f32.mrf.mxu0 }
  0xda   : > { %v487_v36 = vadd.f32 %v486_v31, %v466_v34  ;;  %v605_v37 = vpop.f32.mrf.mxu1  ;;  %v527_v43 = vadd.f32 %v526_v30, %v506_v38 }
  0xdc   : > { %v529_v39 = vmax.f32 %v410_v35, %v487_v36  ;;  %v530_v50 = vmax.f32 %v411_v46, %v527_v43 }
  0xdd   : > { %v585_v40 = vpop.f32.mrf.mxu3 }
  0xde   : > { %v606_v41 = vadd.f32 %v605_v37, %v585_v40 }
  0xe0   : > { %v648_v45 = vmax.f32 %v529_v39, %v606_v41 }
  0xe1   : > { %v645_v47 = vpop.f32.mrf.mxu2 }
  0xe2   : > { %v656_v48 = vadd.f32 %v654_v44, %v648_v45  ;;  %v625_v49 = vpop.f32.mrf.mxu1 }
  0xe3   : > { %v646_v51 = vadd.f32 %v645_v47, %v625_v49 }
  0xe4   : > { %v658_v52 = vmax.f32 %v656_v48, 0.0 }
  0xe5   : > { %v649_v53 = vmax.f32 %v530_v50, %v646_v51 }
  0xe6   : > { %660 = vst [vmem:[%s170_s27] sm:$0xff] %v658_v52 }
  0xe7   : > { %v657_v54 = vadd.f32 %v654_v44, %v649_v53 }
  0xe9   : > { %v659_v55 = vmax.f32 %v657_v54, 0.0 }
  0xeb   : > { %662 = vst.msk [vmem:[%s170_s27 + $0x8] sm:$0xff] %vm661_vm1, %v659_v55 }
  0xec PF: > { %s13_s12 = sadd.s32 1, %s862_s12  }
  0xed   : > { %p10_p4 = scmp.ge.s32.totalorder %s13_s12, 4  }
  0xef   :  { %12 = sbr.rel (!%p10_p4) target bundleno = 1 (0x1), region = 65 }

// kernel: net_forward.6
= control target key start
LH: loop header
LB: loop body
LE: loop exit
PB: predicated region body
PF: predicated region fallthrough
CT: control target
= control target key end

     0   :  { %s477_s12 = smov 0   ;;  %s556_s0 = inlined_call_operand.vmem [shape: f32[2,4,72,36], index: 0, kind: input, shape index: {}]   ;;  %s557_s1 = inlined_call_operand.vmem [shape: f32[16,72], index: 1, kind: input, shape index: {}]   ;;  %s558_s2 = inlined_call_operand.vmem [shape: f32[16,1], index: 2, kind: input, shape index: {}]   ;;  %s559_s3 = inlined_call_operand.vmem [shape: f32[2,16,36], index: 3, kind: output, shape index: {}]  }
   0x1 LB: > { %s391_s13 = sadd.s32 4294967295, %s454_s12   ;;  %p395_p0 = scmp.ge.s32.totalorder %s454_s12, 1  ;;  %s454_s12 = sphi %s477_s12, %s13_s12  }
   0x2   : > { %p137_p1 = scmp.lt.s32.totalorder %s454_s12, 3 }
   0x4   : > { %p138_p2 = pnand %p395_p0, %p137_p1 }
   0x5   : > { %p161_p3 = scmp.lt.s32.totalorder (!%p138_p2), %s391_s13, 1 }
   0x6   : > { %141 = sbr.rel (%p138_p2) target bundleno = 182 (0xb6), region = 32 }
   0xb   : > { %s561_s13 = smov (!%p161_p3, %s391_s13), 1  ;;  %v456_v0 = vmov 0   ;;  %v317_v1 = vld [vmem:[%s558_s2] sm:$0xff]  ;;  %vm182_vm0 = vcmask 588800   ;;  %v318_v39 = vld [vmem:[%s558_s2 + $0x8] sm:$0xff]  ;;  %vm333_vm1 = vcmask 293888  }
   0xc   : > { %447 = vset.pattern.permute.xlu0 %v456_v0  ;;  %s437_s16 = smul.u32 288, %s561_s13  ;;  %v171_v36 = vld [vmem:[%s557_s1] sm:$0xff]  ;;  %v172_v40 = vld [vmem:[%s557_s1 + $0x8] sm:$0xff]  ;;  %s436_s26 = sshll.u32 %s561_s13, 4 }
   0xd   : > { %321 = vperm.xlu0 %447, %v317_v1   ;;  %s170_s29 = scalar_lea.vmem %s559_s3, %s436_s26 }
   0xe   : > { %s494_s19 = scalar_lea.vmem %s556_s0, %s437_s16 }
   0xf   : > { %v420_v2 = vld [vmem:[%s494_s19 + $0xd0] sm:$0xff]  ;;  %v419_v3 = vld [vmem:[%s494_s19 + $0xc8] sm:$0xff]  ;;  %v431_v4 = vld [vmem:[%s494_s19 + $0x118] sm:$0xff] }
  0x10   : > { %264 = vmatpush.msra.mxu2 %v420_v2  ;;  %299 = vmatpush.msra.mxu3 %v431_v4  ;;  %v181_v5 = vld [vmem:[%s494_s19 + $0x40] sm:$0xff]  ;;  %v409_v6 = vld [vmem:[%s494_s19 + $0x88] sm:$0xff]  ;;  %v430_v8 = vld [vmem:[%s494_s19 + $0x110] sm:$0xff] }
  0x11   : > { %v418_v7 = vld [vmem:[%s494_s19 + $0xc0] sm:$0xff]  ;;  %196 = vmatpush.msra.mxu0 %v181_v5  ;;  %229 = vmatpush.msra.mxu1 %v409_v6  ;;  %v180_v9 = vld [vmem:[%s494_s19 + $0x38] sm:$0xff]  ;;  %v429_v11 = vld [vmem:[%s494_s19 + $0x108] sm:$0xff] }
  0x12   : > { %v408_v10 = vld [vmem:[%s494_s19 + $0x80] sm:$0xff]  ;;  %265 = vmatpush.msra.mxu2 %v419_v3  ;;  %300 = vmatpush.msra.mxu3 %v430_v8  ;;  %v179_v12 = vld [vmem:[%s494_s19 + $0x30] sm:$0xff]  ;;  %v417_v13 = vld [vmem:[%s494_s19 + $0xb8] sm:$0xff] }
  0x13   : > { %197 = vmatpush.msra.mxu0 %v180_v9  ;;  %230 = vmatpush.msra.mxu1 %v408_v10  ;;  %v407_v14 = vld [vmem:[%s494_s19 + $0x78] sm:$0xff]  ;;  %v428_v15 = vld [vmem:[%s494_s19 + $0x100] sm:$0xff]  ;;  %v178_v16 = vld [vmem:[%s494_s19 + $0x28] sm:$0xff] }
  0x14   : > { %266 = vmatpush.msra.mxu2 %v418_v7  ;;  %301 = vmatpush.msra.mxu3 %v429_v11  ;;  %v406_v17 = vld [vmem:[%s494_s19 + $0x70] sm:$0xff]  ;;  %v427_v19 = vld [vmem:[%s494_s19 + $0xf8] sm:$0xff]  ;;  %v177_v20 = vld [vmem:[%s494_s19 + $0x20] sm:$0xff] }
  0x15   : > { %198 = vmatpush.msra.mxu0 %v179_v12  ;;  %231 = vmatpush.msra.mxu1 %v407_v14  ;;  %v416_v18 = vld [vmem:[%s494_s19 + $0xb0] sm:$0xff]  ;;  %v405_v21 = vld [vmem:[%s494_s19 + $0x68] sm:$0xff]  ;;  %v176_v24 = vld [vmem:[%s494_s19 + $0x18] sm:$0xff] }
  0x16   : > { %267 = vmatpush.msra.mxu2 %v417_v13  ;;  %302 = vmatpush.msra.mxu3 %v428_v15  ;;  %v415_v22 = vld [vmem:[%s494_s19 + $0xa8] sm:$0xff]  ;;  %v426_v23 = vld [vmem:[%s494_s19 + $0xf0] sm:$0xff]  ;;  %v404_v25 = vld [vmem:[%s494_s19 + $0x60] sm:$0xff] }
  0x17   : > { %199 = vmatpush.msra.mxu0 %v178_v16  ;;  %232 = vmatpush.msra.mxu1 %v406_v17  ;;  %v414_v26 = vld [vmem:[%s494_s19 + $0xa0] sm:$0xff]  ;;  %v425_v27 = vld [vmem:[%s494_s19 + $0xe8] sm:$0xff]  ;;  %v175_v28 = vld [vmem:[%s494_s19 + $0x10] sm:$0xff] }
  0x18   : > { %268 = vmatpush.msra.mxu2 %v416_v18  ;;  %303 = vmatpush.msra.mxu3 %v427_v19  ;;  %v403_v29 = vld [vmem:[%s494_s19 + $0x58] sm:$0xff]  ;;  %v424_v31 = vld [vmem:[%s494_s19 + $0xe0] sm:$0xff]  ;;  %v174_v32 = vld [vmem:[%s494_s19 + $0x8] sm:$0xff] }
  0x19   : > { %200 = vmatpush.msra.mxu0 %v177_v20  ;;  %233 = vmatpush.msra.mxu1 %v405_v21  ;;  %v413_v30 = vld [vmem:[%s494_s19 + $0x98] sm:$0xff]  ;;  %v402_v33 = vld [vmem:[%s494_s19 + $0x50] sm:$0xff]  ;;  %v173_v37 = vld [vmem:[%s494_s19] sm:$0xff] }
  0x1a   : > { %269 = vmatpush.msra.mxu2 %v415_v22  ;;  %304 = vmatpush.msra.mxu3 %v426_v23  ;;  %v412_v34 = vld [vmem:[%s494_s19 + $0x90] sm:$0xff]  ;;  %v423_v35 = vld [vmem:[%s494_s19 + $0xd8] sm:$0xff]  ;;  %v401_v38 = vld [vmem:[%s494_s19 + $0x48] sm:$0xff] }
  0x1b   : > { %201 = vmatpush.msra.mxu0 %v176_v24  ;;  %234 = vmatpush.msra.mxu1 %v404_v25 }
  0x1c   : > { %270 = vmatpush.msra.mxu2 %v414_v26  ;;  %305 = vmatpush.msra.mxu3 %v425_v27 }
  0x1d   : > { %202 = vmatpush.msra.mxu0 %v175_v28  ;;  %235 = vmatpush.msra.mxu1 %v403_v29 }
  0x1e   : > { %271 = vmatpush.msra.mxu2 %v413_v30  ;;  %306 = vmatpush.msra.mxu3 %v424_v31 }
  0x1f   : > { %203 = vmatpush.msra.mxu0 %v174_v32  ;;  %236 = vmatpush.msra.mxu1 %v402_v33 }
  0x20   : > { %272 = vmatpush.msra.mxu2 %v412_v34  ;;  %307 = vmatpush.msra.mxu3 %v423_v35 }
  0x21   : > { %421 = vmatmul.msk.f32.vlgmr.msra.gmra.mxu2 %vm182_vm0, %v171_v36  ;;  %432 = vmatmul.msk.f32.vlgmr.msra.gmra.mxu3 %vm182_vm0, %v171_v36 }
  0x22   : > { %204 = vmatpush.msra.mxu0 %v173_v37  ;;  %237 = vmatpush.msra.mxu1 %v401_v38 }
  0x23   : > { %399 = vmatmul.msk.f32.vlgmr.msra.gmra.mxu0 %vm182_vm0, %v171_v36  ;;  %410 = vmatmul.msk.f32.vlgmr.msra.gmra.mxu1 %vm182_vm0, %v171_v36 }
  0x24   : > { %326 = vperm.xlu0 %447, %v318_v39  }
  0x29   : > { %422 = vmatmul.msk.f32.gmra.mxu2 %vm182_vm0, %v172_v40  ;;  %433 = vmatmul.msk.f32.gmra.mxu3 %vm182_vm0, %v172_v40 }
  0x2b   : > { %400 = vmatmul.msk.f32.gmra.mxu0 %vm182_vm0, %v172_v40  ;;  %411 = vmatmul.msk.f32.gmra.mxu1 %vm182_vm0, %v172_v40 }
  0x7f   : > { %v322_v47 = vpop.permute.xlu0 %321 }
  0x96   : > { %v327_v58 = vpop.permute.xlu0 %326 }
  0xa0   : > { %v206_v41 = vpop.f32.mrf.mxu0  ;;  %v239_v42 = vpop.f32.mrf.mxu1 }
  0xa1   : > { %v245_v43 = vmax.f32 %v206_v41, %v239_v42 }
  0xa4   : > { %v274_v44 = vpop.f32.mrf.mxu2  ;;  %v309_v45 = vpop.f32.mrf.mxu3 }
  0xa5   : > { %v280_v46 = vmax.f32 %v245_v43, %v274_v44 }
  0xa7   : > { %v315_v48 = vmax.f32 %v280_v46, %v309_v45 }
  0xa8   : > { %v209_v49 = vpop.f32.mrf.mxu0  ;;  %v242_v50 = vpop.f32.mrf.mxu1 }
  0xa9   : > { %v329_v51 = vadd.f32 %v322_v47, %v315_v48  ;;  %v246_v52 = vmax.f32 %v209_v49, %v242_v50 }
  0xab   : > { %v331_v53 = vmax.f32 %v329_v51, 0.0 }
  0xac   : > { %v277_v54 = vpop.f32.mrf.mxu2  ;;  %v312_v55 = vpop.f32.mrf.mxu3 }
  0xad   : > { %334 = vst.msk [vmem:[%s170_s29] sm:$0xff] %vm333_vm1, %v331_v53  ;;  %v281_v56 = vmax.f32 %v246_v52, %v277_v54 }
  0xaf   : > { %v316_v57 = vmax.f32 %v281_v56, %v312_v55 }
  0xb1   : > { %v330_v59 = vadd.f32 %v327_v58, %v316_v57 }
  0xb3   : > { %v332_v60 = vmax.f32 %v330_v59, 0.0 }
  0xb5   : > { %335 = vst.msk [vmem:[%s170_s29 + $0x8] sm:$0xff] %vm333_vm1, %v332_v60 }
  0xb6 PF: > { %s13_s12 = sadd.s32 1, %s454_s12  }
  0xb7   : > { %p10_p4 = scmp.ge.s32.totalorder %s13_s12, 4  }
  0xb9   :  { %12 = sbr.rel (!%p10_p4) target bundleno = 1 (0x1), region = 65 }

// kernel: net_forward.7
= control target key start
LH: loop header
LB: loop body
LE: loop exit
PB: predicated region body
PF: predicated region fallthrough
CT: control target
= control target key end

     0   :  { %s715_s0 = inlined_call_operand.vmem [shape: f32[2,576], index: 0, kind: input, shape index: {}]   ;;  %s716_s1 = inlined_call_operand.vmem [shape: f32[576,120], index: 1, kind: input, shape index: {}]   ;;  %s717_s2 = inlined_call_operand.vmem [shape: f32[1,120], index: 2, kind: input, shape index: {}]   ;;  %s718_s3 = inlined_call_operand.vmem [shape: f32[120,84], index: 3, kind: input, shape index: {}]   ;;  %s719_s4 = inlined_call_operand.vmem [shape: f32[1,84], index: 4, kind: input, shape index: {}]   ;;  %s720_s5 = inlined_call_operand.vmem [shape: f32[84,2], index: 5, kind: input, shape index: {}]   ;;  %s721_s6 = inlined_call_operand.vmem [shape: f32[1,2], index: 6, kind: input, shape index: {}]   ;;  %s722_s7 = inlined_call_operand.hbm [shape: f32[2,2], index: 7, kind: output, shape index: {}]  }
   0x1   :  { %v44_v0 = vld [vmem:[%s716_s1 + $0x78] sm:$0xff]  ;;  %v43_v1 = vld [vmem:[%s716_s1 + $0x70] sm:$0xff]  ;;  %v42_v4 = vld [vmem:[%s716_s1 + $0x68] sm:$0xff] }
   0x2   :  { %122 = vmatpush.msra.mxu0 %v44_v0  ;;  %v76_v2 = vld [vmem:[%s716_s1 + $0x178] sm:$0xff]  ;;  %v75_v3 = vld [vmem:[%s716_s1 + $0x170] sm:$0xff]  ;;  %v74_v7 = vld [vmem:[%s716_s1 + $0x168] sm:$0xff] }
   0x3   :  { %162 = vmatpush.msra.mxu2 %v76_v2  ;;  %v92_v5 = vld [vmem:[%s716_s1 + $0x1f8] sm:$0xff]  ;;  %v91_v8 = vld [vmem:[%s716_s1 + $0x1f0] sm:$0xff]  ;;  %v41_v9 = vld [vmem:[%s716_s1 + $0x60] sm:$0xff] }
   0x4   :  { %v60_v6 = vld [vmem:[%s716_s1 + $0xf8] sm:$0xff]  ;;  %123 = vmatpush.msra.mxu0 %v43_v1  ;;  %182 = vmatpush.msra.mxu3 %v92_v5  ;;  %v59_v10 = vld [vmem:[%s716_s1 + $0xf0] sm:$0xff]  ;;  %v90_v11 = vld [vmem:[%s716_s1 + $0x1e8] sm:$0xff] }
   0x5   :  { %163 = vmatpush.msra.mxu2 %v75_v3  ;;  %142 = vmatpush.msra.mxu1 %v60_v6  ;;  %v73_v12 = vld [vmem:[%s716_s1 + $0x160] sm:$0xff]  ;;  %v58_v13 = vld [vmem:[%s716_s1 + $0xe8] sm:$0xff]  ;;  %v40_v14 = vld [vmem:[%s716_s1 + $0x58] sm:$0xff] }
   0x6   :  { %124 = vmatpush.msra.mxu0 %v42_v4  ;;  %183 = vmatpush.msra.mxu3 %v91_v8  ;;  %v89_v15 = vld [vmem:[%s716_s1 + $0x1e0] sm:$0xff]  ;;  %v72_v16 = vld [vmem:[%s716_s1 + $0x158] sm:$0xff]  ;;  %v39_v18 = vld [vmem:[%s716_s1 + $0x50] sm:$0xff] }
   0x7   :  { %164 = vmatpush.msra.mxu2 %v74_v7  ;;  %143 = vmatpush.msra.mxu1 %v59_v10  ;;  %v57_v17 = vld [vmem:[%s716_s1 + $0xe0] sm:$0xff]  ;;  %v88_v19 = vld [vmem:[%s716_s1 + $0x1d8] sm:$0xff]  ;;  %v71_v20 = vld [vmem:[%s716_s1 + $0x150] sm:$0xff] }
   0x8   :  { %125 = vmatpush.msra.mxu0 %v41_v9  ;;  %184 = vmatpush.msra.mxu3 %v90_v11  ;;  %v56_v21 = vld [vmem:[%s716_s1 + $0xd8] sm:$0xff]  ;;  %v38_v22 = vld [vmem:[%s716_s1 + $0x48] sm:$0xff]  ;;  %v87_v23 = vld [vmem:[%s716_s1 + $0x1d0] sm:$0xff] }
   0x9   :  { %165 = vmatpush.msra.mxu2 %v73_v12  ;;  %144 = vmatpush.msra.mxu1 %v58_v13  ;;  %v70_v24 = vld [vmem:[%s716_s1 + $0x148] sm:$0xff]  ;;  %v55_v25 = vld [vmem:[%s716_s1 + $0xd0] sm:$0xff]  ;;  %v37_v26 = vld [vmem:[%s716_s1 + $0x40] sm:$0xff] }
   0xa   :  { %126 = vmatpush.msra.mxu0 %v40_v14  ;;  %185 = vmatpush.msra.mxu3 %v89_v15  ;;  %v86_v27 = vld [vmem:[%s716_s1 + $0x1c8] sm:$0xff]  ;;  %v69_v28 = vld [vmem:[%s716_s1 + $0x140] sm:$0xff]  ;;  %v36_v30 = vld [vmem:[%s716_s1 + $0x38] sm:$0xff] }
   0xb   :  { %166 = vmatpush.msra.mxu2 %v72_v16  ;;  %145 = vmatpush.msra.mxu1 %v57_v17  ;;  %v54_v29 = vld [vmem:[%s716_s1 + $0xc8] sm:$0xff]  ;;  %v85_v31 = vld [vmem:[%s716_s1 + $0x1c0] sm:$0xff]  ;;  %v68_v32 = vld [vmem:[%s716_s1 + $0x138] sm:$0xff] }
   0xc   :  { %127 = vmatpush.msra.mxu0 %v39_v18  ;;  %186 = vmatpush.msra.mxu3 %v88_v19  ;;  %v53_v33 = vld [vmem:[%s716_s1 + $0xc0] sm:$0xff]  ;;  %v35_v34 = vld [vmem:[%s716_s1 + $0x30] sm:$0xff]  ;;  %v84_v35 = vld [vmem:[%s716_s1 + $0x1b8] sm:$0xff] }
   0xd   :  { %167 = vmatpush.msra.mxu2 %v71_v20  ;;  %146 = vmatpush.msra.mxu1 %v56_v21  ;;  %v67_v36 = vld [vmem:[%s716_s1 + $0x130] sm:$0xff]  ;;  %v52_v37 = vld [vmem:[%s716_s1 + $0xb8] sm:$0xff]  ;;  %v34_v38 = vld [vmem:[%s716_s1 + $0x28] sm:$0xff] }
   0xe   :  { %128 = vmatpush.msra.mxu0 %v38_v22  ;;  %187 = vmatpush.msra.mxu3 %v87_v23  ;;  %v83_v39 = vld [vmem:[%s716_s1 + $0x1b0] sm:$0xff]  ;;  %v66_v40 = vld [vmem:[%s716_s1 + $0x128] sm:$0xff]  ;;  %v33_v42 = vld [vmem:[%s716_s1 + $0x20] sm:$0xff] }
   0xf   :  { %168 = vmatpush.msra.mxu2 %v70_v24  ;;  %147 = vmatpush.msra.mxu1 %v55_v25  ;;  %v51_v41 = vld [vmem:[%s716_s1 + $0xb0] sm:$0xff]  ;;  %v82_v43 = vld [vmem:[%s716_s1 + $0x1a8] sm:$0xff]  ;;  %v65_v44 = vld [vmem:[%s716_s1 + $0x120] sm:$0xff] }
  0x10   :  { %129 = vmatpush.msra.mxu0 %v37_v26  ;;  %188 = vmatpush.msra.mxu3 %v86_v27  ;;  %v50_v45 = vld [vmem:[%s716_s1 + $0xa8] sm:$0xff]  ;;  %v27_v46 = vld [vmem:[%s715_s0] sm:$0xff]  ;;  %v32_v47 = vld [vmem:[%s716_s1 + $0x18] sm:$0xff] }
  0x11   :  { %169 = vmatpush.msra.mxu2 %v69_v28  ;;  %148 = vmatpush.msra.mxu1 %v54_v29  ;;  %v81_v48 = vld [vmem:[%s716_s1 + $0x1a0] sm:$0xff]  ;;  %107 = vst [vmem:[#allocation1] ss:$4 sm:$0xff] %v27_v46  ;;  %v64_v49 = vld [vmem:[%s716_s1 + $0x118] sm:$0xff]  ;;  %v31_v51 = vld [vmem:[%s716_s1 + $0x10] sm:$0xff] }
  0x12   :  { %130 = vmatpush.msra.mxu0 %v36_v30  ;;  %189 = vmatpush.msra.mxu3 %v85_v31  ;;  %v49_v50 = vld [vmem:[%s716_s1 + $0xa0] sm:$0xff]  ;;  %v80_v52 = vld [vmem:[%s716_s1 + $0x198] sm:$0xff]  ;;  %v28_v53 = vld [vmem:[%s715_s0 + $0x8] sm:$0x3] }
  0x13   :  { %170 = vmatpush.msra.mxu2 %v68_v32  ;;  %149 = vmatpush.msra.mxu1 %v53_v33  ;;  %v30_v54 = vld [vmem:[%s716_s1 + $0x8] sm:$0xff]  ;;  %v63_v55 = vld [vmem:[%s716_s1 + $0x110] sm:$0xff]  ;;  %v48_v56 = vld [vmem:[%s716_s1 + $0x98] sm:$0xff]  ;;  %109 = vst [vmem:[#allocation1 + $0x20] ss:$4 sm:$0xff] %v28_v53 }
  0x14   :  { %131 = vmatpush.msra.mxu0 %v35_v34  ;;  %190 = vmatpush.msra.mxu3 %v84_v35  ;;  %v29_v57 = vld [vmem:[%s716_s1] sm:$0xff]  ;;  %v62_v58 = vld [vmem:[%s716_s1 + $0x108] sm:$0xff]  ;;  %v79_v59 = vld [vmem:[%s716_s1 + $0x190] sm:$0xff] }
  0x15   :  { %171 = vmatpush.msra.mxu2 %v67_v36  ;;  %150 = vmatpush.msra.mxu1 %v52_v37  ;;  %v47_v60 = vld [vmem:[%s716_s1 + $0x90] sm:$0xff]  ;;  %v78_v61 = vld [vmem:[%s716_s1 + $0x188] sm:$0xff] }
  0x16   :  { %132 = vmatpush.msra.mxu0 %v34_v38  ;;  %191 = vmatpush.msra.mxu3 %v83_v39 }
  0x17   :  { %172 = vmatpush.msra.mxu2 %v66_v40  ;;  %151 = vmatpush.msra.mxu1 %v51_v41 }
  0x18   :  { %133 = vmatpush.msra.mxu0 %v33_v42  ;;  %192 = vmatpush.msra.mxu3 %v82_v43 }
  0x19   :  { %173 = vmatpush.msra.mxu2 %v65_v44  ;;  %152 = vmatpush.msra.mxu1 %v50_v45 }
  0x1a   :  { %134 = vmatpush.msra.mxu0 %v32_v47  ;;  %193 = vmatpush.msra.mxu3 %v81_v48 }
  0x1b   :  { %174 = vmatpush.msra.mxu2 %v64_v49  ;;  %153 = vmatpush.msra.mxu1 %v49_v50 }
  0x1c   :  { %135 = vmatpush.msra.mxu0 %v31_v51  ;;  %194 = vmatpush.msra.mxu3 %v80_v52 }
  0x1d   :  { %175 = vmatpush.msra.mxu2 %v63_v55  ;;  %154 = vmatpush.msra.mxu1 %v48_v56 }
  0x1e   :  { %12 = vsyncpa [#allocation3], 0  ;;  %136 = vmatpush.msra.mxu0 %v30_v54  ;;  %v100_v62 = vld [vmem:[%s716_s1 + $0x238] sm:$0xff]  ;;  %195 = vmatpush.msra.mxu3 %v79_v59  ;;  %v61_v63 = vld [vmem:[%s716_s1 + $0x100] sm:$0xff]  ;;  %vm119_vm0 = vcmask 523264   ;;  %vm286_vm1 = vcmask 1043456  }
  0x1f   :  { %176 = vmatpush.msra.mxu2 %v62_v58  ;;  %155 = vmatpush.msra.mxu1 %v47_v60  ;;  %v112_v0 = vld.sshfl [vmem:[#allocation1 + $0x10] sm:$0xff pattern:$0x73625140]  ;;  %v46_v1 = vld [vmem:[%s716_s1 + $0x88] sm:$0xff]  ;;  %v77_v3 = vld [vmem:[%s716_s1 + $0x180] sm:$0xff]  ;;  %vm242_vm2 = vcmask 982016  }
  0x20   :  { %137 = vmatpush.msra.mxu0 %v29_v57  ;;  %v99_v2 = vld [vmem:[%s716_s1 + $0x230] sm:$0xff]  ;;  %196 = vmatpush.msra.mxu3 %v78_v61  ;;  %v110_v4 = vld.sshfl [vmem:[#allocation1] sm:$0xff pattern:$0x73625140]  ;;  %v98_v6 = vld [vmem:[%s716_s1 + $0x228] sm:$0xff]  ;;  %vm282_vm3 = vcmask 687104  }
  0x21   :  { %177 = vmatpush.msra.mxu2 %v61_v63  ;;  %v113_v5 = vld.sshfl [vmem:[#allocation1 + $0x18] sm:$0xff pattern:$0x73625140]  ;;  %156 = vmatpush.msra.mxu1 %v46_v1  ;;  %v45_v7 = vld [vmem:[%s716_s1 + $0x80] sm:$0xff]  ;;  %v237_v10 = vld [vmem:[%s718_s3 + $0x70] sm:$0xff]  ;;  %s362_s15 = smov [#allocation2]  }
  0x22   :  { %210 = vmatpush.msrb.mxu0 %v100_v62  ;;  %178 = vmatmul.f32.vlgmr.msra.gmra.mxu2 %v112_v0  ;;  %v111_v8 = vld.sshfl [vmem:[#allocation1 + $0x8] sm:$0xff pattern:$0x73625140]  ;;  %v97_v9 = vld [vmem:[%s716_s1 + $0x220] sm:$0xff]  ;;  %v96_v11 = vld [vmem:[%s716_s1 + $0x218] sm:$0xff]  ;;  %s317_s16 = sshll.u32 %s362_s15, 4  ;;  %s318_s16 = int_to_ptr.vmem [resolvable:$true] %s317_s16 }
  0x23   :  { %197 = vmatpush.msra.mxu3 %v77_v3  ;;  %138 = vmatmul.f32.vlgmr.msra.gmra.mxu0 %v110_v4  ;;  %v236_v12 = vld [vmem:[%s718_s3 + $0x68] sm:$0xff]  ;;  %v95_v13 = vld [vmem:[%s716_s1 + $0x210] sm:$0xff]  ;;  %v235_v14 = vld [vmem:[%s718_s3 + $0x60] sm:$0xff]  ;;  %vm310_vm4 = vcmask 9216  }
  0x24   :  { %211 = vmatpush.msrb.mxu0 %v99_v2  ;;  %198 = vmatmul.f32.vlgmr.msra.gmra.mxu3 %v113_v5  ;;  %v94_v15 = vld [vmem:[%s716_s1 + $0x208] sm:$0xff]  ;;  %v234_v16 = vld [vmem:[%s718_s3 + $0x58] sm:$0xff]  ;;  %v93_v17 = vld [vmem:[%s716_s1 + $0x200] sm:$0xff] }
  0x25   :  { %157 = vmatpush.msra.mxu1 %v45_v7  ;;  %v233_v18 = vld [vmem:[%s718_s3 + $0x50] sm:$0xff]  ;;  %v114_v19 = vld.sshfl [vmem:[#allocation1 + $0x20] sm:$0xff pattern:$0x73625140]  ;;  %v232_v20 = vld [vmem:[%s718_s3 + $0x48] sm:$0xff] }
  0x26   :  { %212 = vmatpush.msrb.mxu0 %v98_v6  ;;  %158 = vmatmul.f32.vlgmr.msra.gmra.mxu1 %v111_v8  ;;  %v231_v21 = vld [vmem:[%s718_s3 + $0x40] sm:$0xff]  ;;  %v230_v22 = vld [vmem:[%s718_s3 + $0x38] sm:$0xff]  ;;  %v229_v23 = vld [vmem:[%s718_s3 + $0x30] sm:$0xff] }
  0x27   :  { %247 = vmatpush.msrb.mxu1 %v237_v10  ;;  %v228_v24 = vld [vmem:[%s718_s3 + $0x28] sm:$0xff]  ;;  %v227_v25 = vld [vmem:[%s718_s3 + $0x20] sm:$0xff]  ;;  %v226_v26 = vld [vmem:[%s718_s3 + $0x18] sm:$0xff] }
  0x28   :  { %213 = vmatpush.msrb.mxu0 %v97_v9  ;;  %v225_v27 = vld [vmem:[%s718_s3 + $0x10] sm:$0xff]  ;;  %v224_v28 = vld [vmem:[%s718_s3 + $0x8] sm:$0xff]  ;;  %v223_v29 = vld [vmem:[%s718_s3] sm:$0xff] }
  0x29   :  { %248 = vmatpush.msrb.mxu1 %v236_v12  ;;  %v277_v30 = vld [vmem:[%s720_s5 + $0x50] sm:$0xf]  ;;  %v276_v31 = vld [vmem:[%s720_s5 + $0x48] sm:$0xff]  ;;  %v275_v32 = vld [vmem:[%s720_s5 + $0x40] sm:$0xff] }
  0x2a   :  { %214 = vmatpush.msrb.mxu0 %v96_v11  ;;  %330 = vmatpush.msk.msrb.mxu2 %vm286_vm1, %v277_v30  ;;  %v274_v33 = vld [vmem:[%s720_s5 + $0x38] sm:$0xff]  ;;  %v273_v34 = vld [vmem:[%s720_s5 + $0x30] sm:$0xff]  ;;  %v272_v35 = vld [vmem:[%s720_s5 + $0x28] sm:$0xff] }
  0x2b   :  { %249 = vmatpush.msrb.mxu1 %v235_v14  ;;  %v271_v36 = vld [vmem:[%s720_s5 + $0x20] sm:$0xff]  ;;  %v270_v38 = vld [vmem:[%s720_s5 + $0x18] sm:$0xff]  ;;  %v269_v50 = vld [vmem:[%s720_s5 + $0x10] sm:$0xff] }
  0x2c   :  { %215 = vmatpush.msrb.mxu0 %v95_v13  ;;  %296 = vmatpush.msrb.mxu2 %v276_v31  ;;  %v333_v37 = vld [vmem:[%s717_s2] ss:$0 sm:$0xff]  ;;  %v268_v51 = vld [vmem:[%s720_s5 + $0x8] sm:$0xff] }
  0x2d   :  { %250 = vmatpush.msrb.mxu1 %v234_v16  ;;  %v267_v52 = vld [vmem:[%s720_s5] sm:$0xff]  ;;  %s319_s5 = sshll.u32 %s722_s7, 4  ;;  %s320_s5 = int_to_ptr.hbm [resolvable:$true] %s319_s5 }
  0x2e   :  { %216 = vmatpush.msrb.mxu0 %v94_v15  ;;  %297 = vmatpush.msrb.mxu2 %v275_v32  ;;  %v334_v53 = vld [vmem:[%s719_s4] ss:$0 sm:$0xff] }
  0x2f   :  { %251 = vmatpush.msrb.mxu1 %v233_v18  ;;  %v335_v57 = vld [vmem:[%s721_s6] ss:$0 sm:$0xff] }
  0x30   :  { %217 = vmatpush.msrb.mxu0 %v93_v17  ;;  %298 = vmatpush.msrb.mxu2 %v274_v33 }
  0x31   :  { %328 = vmatmul.msk.f32.vlgmr.msrb.gmra.mxu0 %vm119_vm0, %v114_v19  ;;  %252 = vmatpush.msrb.mxu1 %v232_v20 }
  0x32   :  { %299 = vmatpush.msrb.mxu2 %v273_v34 }
  0x33   :  { %253 = vmatpush.msrb.mxu1 %v231_v21 }
  0x34   :  { %300 = vmatpush.msrb.mxu2 %v272_v35 }
  0x35   :  { %254 = vmatpush.msrb.mxu1 %v230_v22 }
  0x36   :  { %301 = vmatpush.msrb.mxu2 %v271_v36 }
  0x37   :  { %255 = vmatpush.msrb.mxu1 %v229_v23 }
  0x38   :  { %302 = vmatpush.msrb.mxu2 %v270_v38 }
  0x39   :  { %256 = vmatpush.msrb.mxu1 %v228_v24 }
  0x3a   :  { %303 = vmatpush.msrb.mxu2 %v269_v50 }
  0x3b   :  { %257 = vmatpush.msrb.mxu1 %v227_v25 }
  0x3c   :  { %304 = vmatpush.msrb.mxu2 %v268_v51 }
  0x3d   :  { %258 = vmatpush.msrb.mxu1 %v226_v26 }
  0x3e   :  { %305 = vmatpush.msrb.mxu2 %v267_v52 }
  0x3f   :  { %259 = vmatpush.msrb.mxu1 %v225_v27 }
  0x41   :  { %260 = vmatpush.msrb.mxu1 %v224_v28 }
  0x43   :  { %261 = vmatpush.msrb.mxu1 %v223_v29 }
  0xa0   :  { %v139_v39 = vpop.f32.mrf.mxu0 }
  0xa1   :  { %v140_v40 = vadd.f32 %v333_v37, %v139_v39 }
  0xa3   :  { %v159_v41 = vpop.f32.mrf.mxu1 }
  0xa4   :  { %v160_v42 = vadd.f32 %v159_v41, %v140_v40 }
  0xa5   :  { %v179_v43 = vpop.f32.mrf.mxu2 }
  0xa6   :  { %v180_v44 = vadd.f32 %v179_v43, %v160_v42 }
  0xa7   :  { %v199_v45 = vpop.f32.mrf.mxu3 }
  0xa8   :  { %v200_v46 = vadd.f32 %v199_v45, %v180_v44 }
  0xae   :  { %v219_v47 = vpop.f32.mrf.mxu0 }
  0xaf   :  { %v220_v48 = vadd.f32 %v219_v47, %v200_v46 }
  0xb1   :  { %v222_v49 = vmax.f32 %v220_v48, 0.0 }
  0xb3   :  { %329 = vmatmul.msk.f32.vlgmr.msrb.gmra.mxu1 %vm242_vm2, %v222_v49 }
 0x130   :  { %v263_v54 = vpop.f32.mrf.mxu1 }
 0x131   :  { %v264_v55 = vadd.f32 %v334_v53, %v263_v54 }
 0x133   :  { %v266_v56 = vmax.f32 %v264_v55, 0.0 }
 0x135   :  { %331 = vmatmul.msk.f32.vlgmr.msrb.gmra.mxu2 %vm282_vm3, %v266_v56 }
 0x1b8   :  { %v307_v58 = vpop.f32.mrf.mxu2 }
 0x1b9   :  { %v308_v59 = vadd.f32 %v335_v57, %v307_v58 }
 0x1bb   :  { %311 = vst.msk [vmem:[#allocation2] sm:$0x3] %vm310_vm4, %v308_v59 }
 0x1bc   :  { %322 = dma.vmem_to_hbm [thread:$0]  %s318_s16, 32, %s320_s5, [#allocation3]  }
 0x1bd   :  { %360 = dma.done.wait [#allocation3], 32  }
 0x1be   :  { %361 = vsyncadd [#allocation3], 4294967264 }
 0x1bf   :  { %327 = vsyncpa [#allocation3], 1 }

</bundles_post_ra>
